<compile_context>
chip_gen: v7x
topology: tpu7x:2x2x1
jax: 0.10.0
libtpu: 0.0.40
codegen_flags: <defaults>
</compile_context>

<pallas_src>
import numpy as np

import jax
import jax.numpy as jnp
from jax.experimental import pallas as pl
from jax.experimental.pallas import tpu as pltpu


# ---------------------------------------------------------------------------
# The fused kernel: conv1+relu+pool1 -> conv2+relu+pool2 -> fc1 -> fc2 -> fc3
# One grid step == TB images, all activations kept in a flat (TB*H, W) layout.
# ---------------------------------------------------------------------------
def _lenet_kernel(x_ref, t1_ref, b1_ref, dm1_ref, t2_ref, b2_ref, dm2_ref,
                  w1_ref, fb1_ref, dm3_ref, fw2_ref, fb2_ref, fw3_ref, fb3_ref,
                  o_ref):
    f32, bf16 = jnp.float32, jnp.bfloat16

    def mm(a, b):
        # bf16 operands, f32 accumulation -> single-pass MXU matmul.
        return jnp.dot(a.astype(bf16), b.astype(bf16),
                       preferred_element_type=f32)

    def shifted_cat(a, taps):
        # Lane-axis concat of `taps` row-shifted copies of `a`: the K-fused
        # conv/fc LHS.  Static shifts lower to slices+concat; wrapped rows
        # only feed junk output rows which the decimation matmuls drop.
        return jnp.concatenate(
            [a if s == 0 else jnp.roll(a, -s, axis=0) for s in range(taps)],
            axis=1)

    def pool_max(a):
        # 2x2/stride-2 max-pool window max at FULL lane width (no ragged
        # 167/159 operands); the stride-2 selection happens afterwards via
        # the dm decimation matmuls / weights with the decimation folded in.
        a = jnp.maximum(a, jnp.roll(a, -1, axis=0))      # row-pair max
        return jnp.maximum(a, jnp.roll(a, -1, axis=1))   # col-pair max

    x = x_ref[...]                                       # (TB*32, 32) f32

    # conv1 + bias + ReLU: one (TB*32,160)@(160,168) matmul.  Rows >= 28 of
    # each image's 32-row block are junk and are dropped by dm1.
    a1 = jnp.maximum(mm(shifted_cat(x, 5), t1_ref[...]) + b1_ref[...], 0.0)

    # maxpool 2x2/2 -> (TB*16, 168); pooled row r of image b sits at b*16+r.
    p1 = mm(dm1_ref[...], pool_max(a1))

    # conv2 + bias + ReLU: one (TB*16,840)@(840,160) matmul (pool1's column
    # decimation is folded into t2).  Rows >= 10 per image are junk.
    a2 = jnp.maximum(mm(shifted_cat(p1, 5), t2_ref[...]) + b2_ref[...], 0.0)

    # maxpool 2x2/2 -> (TB*8, 160)
    p2 = mm(dm2_ref[...], pool_max(a2))

    # fc1: one (TB*8,800)@(800,120) matmul (pool2 column decimation + torch
    # (C,H,W) flatten order folded into w1); image b's row is b*8, selected
    # by dm3 before bias + ReLU.
    h3 = mm(shifted_cat(p2, 5), w1_ref[...])             # (TB*8, 120)
    y = jnp.maximum(mm(dm3_ref[...], h3) + fb1_ref[...], 0.0)   # (TB, 120)

    # fc2 + ReLU, fc3 (padded to 128 lanes -> dense (TB, 128) store).
    y = jnp.maximum(mm(y, fw2_ref[...]) + fb2_ref[...], 0.0)    # (TB, 84)
    o_ref[0] = mm(y, fw3_ref[...]) + fb3_ref[...]               # (TB, 128)


_KP_ORDER = ("t1", "b1", "dm1", "t2", "b2", "dm2",
             "w1", "fb1", "dm3", "fw2", "fb2", "fw3", "fb3")


def net_forward(x_nchw, kp):
    """Forward pass of `Net` for NCHW input (B, 1, 32, 32)."""
    B = x_nchw.shape[0]
    tb = kp["dm3"].shape[0]                  # images per grid step (static)
    nblk = (B + tb - 1) // tb
    Bp = nblk * tb

    x = x_nchw.reshape(B, 32, 32)            # C_in == 1
    if Bp != B:                              # pad batch to a multiple of tb
        x = jnp.concatenate([x, jnp.zeros((Bp - B, 32, 32), x.dtype)], axis=0)
    x2d = x.reshape(Bp * 32, 32)             # flat (batch*rows, cols) layout

    weights = [kp[k] for k in _KP_ORDER]
    in_specs = [pl.BlockSpec((tb * 32, 32), lambda g: (g, 0))]
    for w in weights:   # grid-invariant blocks: fetched into VMEM only once
        in_specs.append(pl.BlockSpec(w.shape, lambda g, _n=w.ndim: (0,) * _n))

    out = pl.pallas_call(
        _lenet_kernel,
        grid=(nblk,),
        in_specs=in_specs,
        out_specs=pl.BlockSpec((1, tb, 128), lambda g: (g, 0, 0)),
        out_shape=jax.ShapeDtypeStruct((nblk, tb, 128), jnp.float32),
        compiler_params=pltpu.CompilerParams(
            dimension_semantics=("parallel",)),   # batch blocks across TCs
    )(x2d, *weights)
    return out.reshape(Bp, 128)[:B, :10]     # drop batch + lane padding


# ---------------------------------------------------------------------------
# Host-side (one-time) weight preprocessing: K-fused Toeplitz conv slabs,
# fused pooling decimation, torch flatten order, bf16 operands, lane padding.
# ---------------------------------------------------------------------------
def prepare_kernel_params(params, tb=8):
    w1 = np.asarray(params["conv1_w"], np.float32)   # (6, 1, 5, 5)
    b1 = np.asarray(params["conv1_b"], np.float32)
    w2 = np.asarray(params["conv2_w"], np.float32)   # (16, 6, 5, 5)
    b2 = np.asarray(params["conv2_b"], np.float32)
    f1w = np.asarray(params["fc1_w"], np.float32)    # (120, 400)
    f1b = np.asarray(params["fc1_b"], np.float32)
    f2w = np.asarray(params["fc2_w"], np.float32)    # (84, 120)
    f2b = np.asarray(params["fc2_b"], np.float32)
    f3w = np.asarray(params["fc3_w"], np.float32)    # (10, 84)
    f3b = np.asarray(params["fc3_b"], np.float32)

    # conv1: K-fused Toeplitz slab.  LHS column di*32 + j, output col o*28 + n.
    t1 = np.zeros((5 * 32, 6 * 28), np.float32)
    for di in range(5):
        for o in range(6):
            for n in range(28):
                for dj in range(5):
                    t1[di * 32 + n + dj, o * 28 + n] = w1[o, 0, di, dj]
    b1row = np.repeat(b1, 28)[None, :]               # (1, 168)

    # conv2: K-fused slab with pool1's column decimation folded in.
    # Pooled feature (c, row, s) lives at column c*28 + 2*s of the 168-wide map.
    t2 = np.zeros((5 * 168, 16 * 10), np.float32)
    for di in range(5):
        for o in range(16):
            for c in range(6):
                for n in range(10):
                    for dj in range(5):
                        t2[di * 168 + c * 28 + 2 * (n + dj), o * 10 + n] = \
                            w2[o, c, di, dj]
    b2row = np.repeat(b2, 10)[None, :]               # (1, 160)

    # fc1: K-fused slab with pool2's column decimation + torch (C,H,W)
    # flatten folded in.  Pooled feature (o, s, sc) -> LHS col s*160+o*10+2*sc.
    w1c = np.zeros((5 * 160, 120), np.float32)
    for s in range(5):
        for o in range(16):
            for sc in range(5):
                w1c[s * 160 + o * 10 + 2 * sc, :] = f1w[:, o * 25 + s * 5 + sc]

    # 0/1 row-decimation matrices (stride-2 pool row select), block-diag per
    # image inside the TB-image tile.  Unselected rows are exact zeros.
    dm1 = np.zeros((tb * 16, tb * 32), np.float32)
    for b in range(tb):
        for r in range(14):
            dm1[b * 16 + r, b * 32 + 2 * r] = 1.0
    dm2 = np.zeros((tb * 8, tb * 16), np.float32)
    for b in range(tb):
        for s in range(5):
            dm2[b * 8 + s, b * 16 + 2 * s] = 1.0
    dm3 = np.zeros((tb, tb * 8), np.float32)
    for b in range(tb):
        dm3[b, b * 8] = 1.0

    # fc3 padded to 128 output lanes for a lane-dense final store.
    f3wp = np.zeros((84, 128), np.float32)
    f3wp[:, :10] = f3w.T
    f3bp = np.zeros((1, 128), np.float32)
    f3bp[0, :10] = f3b

    bf = jnp.bfloat16
    return {
        "t1": jnp.asarray(t1, bf), "b1": jnp.asarray(b1row),
        "dm1": jnp.asarray(dm1, bf),
        "t2": jnp.asarray(t2, bf), "b2": jnp.asarray(b2row),
        "dm2": jnp.asarray(dm2, bf),
        "w1": jnp.asarray(w1c, bf), "fb1": jnp.asarray(f1b[None, :]),
        "dm3": jnp.asarray(dm3, bf),
        "fw2": jnp.asarray(f2w.T.copy(), bf), "fb2": jnp.asarray(f2b[None, :]),
        "fw3": jnp.asarray(f3wp, bf), "fb3": jnp.asarray(f3bp),
    }


# ---------------------------------------------------------------------------
# Pure-JAX reference (correctness cross-check) and parameter init.
# ---------------------------------------------------------------------------
def net_forward_reference(x_nchw, params):
    dn = ("NCHW", "OIHW", "NCHW")
    hp = jax.lax.Precision.HIGHEST
    x = jax.lax.conv_general_dilated(x_nchw, params["conv1_w"], (1, 1), "VALID",
                                     dimension_numbers=dn, precision=hp)
    x = jnp.maximum(x + params["conv1_b"][None, :, None, None], 0.0)
    x = jax.lax.reduce_window(x, -jnp.inf, jax.lax.max,
                              (1, 1, 2, 2), (1, 1, 2, 2), "VALID")
    x = jax.lax.conv_general_dilated(x, params["conv2_w"], (1, 1), "VALID",
                                     dimension_numbers=dn, precision=hp)
    x = jnp.maximum(x + params["conv2_b"][None, :, None, None], 0.0)
    x = jax.lax.reduce_window(x, -jnp.inf, jax.lax.max,
                              (1, 1, 2, 2), (1, 1, 2, 2), "VALID")
    x = x.reshape(x.shape[0], -1)                       # torch (C,H,W) flatten
    x = jnp.maximum(jnp.dot(x, params["fc1_w"].T, precision=hp)
                    + params["fc1_b"], 0.0)
    x = jnp.maximum(jnp.dot(x, params["fc2_w"].T, precision=hp)
                    + params["fc2_b"], 0.0)
    return jnp.dot(x, params["fc3_w"].T, precision=hp) + params["fc3_b"]


def init_params(key):
    def uni(k, shape, fan_in):
        bound = 1.0 / (fan_in ** 0.5)
        return jax.random.uniform(k, shape, jnp.float32, -bound, bound)

    ks = jax.random.split(key, 10)
    return {
        "conv1_w": uni(ks[0], (6, 1, 5, 5), 1 * 5 * 5),
        "conv1_b": uni(ks[1], (6,), 1 * 5 * 5),
        "conv2_w": uni(ks[2], (16, 6, 5, 5), 6 * 5 * 5),
        "conv2_b": uni(ks[3], (16,), 6 * 5 * 5),
        "fc1_w": uni(ks[4], (120, 400), 400),
        "fc1_b": uni(ks[5], (120,), 400),
        "fc2_w": uni(ks[6], (84, 120), 120),
        "fc2_b": uni(ks[7], (84,), 120),
        "fc3_w": uni(ks[8], (10, 84), 84),
        "fc3_b": uni(ks[9], (10,), 84),
    }


if __name__ == "__main__":
    root = jax.random.PRNGKey(0)
    k_params, k_in1, k_in2 = jax.random.split(root, 3)
    params = init_params(k_params)

    fwd = jax.jit(net_forward)

    # Small demo batch (B=2): 1 image/step so the grid still has 2 steps
    # (both v7x TensorCores get work).  LeNet needs 1x32x32 inputs.
    x_small = jax.random.normal(k_in1, (2, 1, 32, 32), dtype=jnp.float32)
    kp1 = prepare_kernel_params(params, tb=1)
    out_small = fwd(x_small, kp1)
    jax.block_until_ready(out_small)
    assert out_small.shape == (2, 10), out_small.shape
    assert out_small.dtype == jnp.float32

    ref_small = net_forward_reference(x_small, params)
    err1 = float(jnp.max(jnp.abs(out_small - ref_small)))
    assert jnp.allclose(out_small, ref_small, atol=2e-2, rtol=2e-2), \
        f"max_err={err1}"   # tolerance covers bf16-operand matmuls

    # Batched perf configuration: 8 images per grid step, grid=(4,).
    x_big = jax.random.normal(k_in2, (32, 1, 32, 32), dtype=jnp.float32)
    kp8 = prepare_kernel_params(params, tb=8)
    out_big = fwd(x_big, kp8)
    jax.block_until_ready(out_big)
    assert out_big.shape == (32, 10), out_big.shape

    ref_big = net_forward_reference(x_big, params)
    err8 = float(jnp.max(jnp.abs(out_big - ref_big)))
    assert jnp.allclose(out_big, ref_big, atol=2e-2, rtol=2e-2), \
        f"max_err={err8}"

    print("KERNEL_OK")
</pallas_src>

<mosaic_0001>
module attributes {stable_mosaic.version = 11 : i64} {
  func.func @_lenet_kernel(%arg0: i32, %arg1: memref<32x32xf32, #tpu.memory_space<vmem>>, %arg2: memref<160x168xbf16, #tpu.memory_space<vmem>>, %arg3: memref<1x168xf32, #tpu.memory_space<vmem>>, %arg4: memref<16x32xbf16, #tpu.memory_space<vmem>>, %arg5: memref<840x160xbf16, #tpu.memory_space<vmem>>, %arg6: memref<1x160xf32, #tpu.memory_space<vmem>>, %arg7: memref<8x16xbf16, #tpu.memory_space<vmem>>, %arg8: memref<800x120xbf16, #tpu.memory_space<vmem>>, %arg9: memref<1x120xf32, #tpu.memory_space<vmem>>, %arg10: memref<1x8xbf16, #tpu.memory_space<vmem>>, %arg11: memref<120x84xbf16, #tpu.memory_space<vmem>>, %arg12: memref<1x84xf32, #tpu.memory_space<vmem>>, %arg13: memref<84x128xbf16, #tpu.memory_space<vmem>>, %arg14: memref<1x128xf32, #tpu.memory_space<vmem>>, %arg15: memref<1x1x128xf32, #tpu.memory_space<vmem>>) attributes {dimension_semantics = [#tpu.dimension_semantics<parallel>], iteration_bounds = array<i64: 2>, scalar_prefetch = 0 : i64, scratch_operands = 0 : i64, tpu.core_type = #tpu.core_type<tc>, window_params = [{transform_indices = @transform_0, window_bounds = array<i64: 32, 32>}, {pipeline_mode = #tpu.pipeline_mode<synchronous>, transform_indices = @transform_1, window_bounds = array<i64: 160, 168>}, {pipeline_mode = #tpu.pipeline_mode<synchronous>, transform_indices = @transform_2, window_bounds = array<i64: 1, 168>}, {pipeline_mode = #tpu.pipeline_mode<synchronous>, transform_indices = @transform_3, window_bounds = array<i64: 16, 32>}, {pipeline_mode = #tpu.pipeline_mode<synchronous>, transform_indices = @transform_4, window_bounds = array<i64: 840, 160>}, {pipeline_mode = #tpu.pipeline_mode<synchronous>, transform_indices = @transform_5, window_bounds = array<i64: 1, 160>}, {pipeline_mode = #tpu.pipeline_mode<synchronous>, transform_indices = @transform_6, window_bounds = array<i64: 8, 16>}, {pipeline_mode = #tpu.pipeline_mode<synchronous>, transform_indices = @transform_7, window_bounds = array<i64: 800, 120>}, {pipeline_mode = #tpu.pipeline_mode<synchronous>, transform_indices = @transform_8, window_bounds = array<i64: 1, 120>}, {pipeline_mode = #tpu.pipeline_mode<synchronous>, transform_indices = @transform_9, window_bounds = array<i64: 1, 8>}, {pipeline_mode = #tpu.pipeline_mode<synchronous>, transform_indices = @transform_10, window_bounds = array<i64: 120, 84>}, {pipeline_mode = #tpu.pipeline_mode<synchronous>, transform_indices = @transform_11, window_bounds = array<i64: 1, 84>}, {pipeline_mode = #tpu.pipeline_mode<synchronous>, transform_indices = @transform_12, window_bounds = array<i64: 84, 128>}, {pipeline_mode = #tpu.pipeline_mode<synchronous>, transform_indices = @transform_13, window_bounds = array<i64: 1, 128>}, {transform_indices = @transform_14, window_bounds = array<i64: 1, 1, 128>}]} {
    %c0 = arith.constant 0 : index
    %c0_0 = arith.constant 0 : index
    %0 = vector.load %arg1[%c0, %c0_0] : memref<32x32xf32, #tpu.memory_space<vmem>>, vector<32x32xf32>
    %1 = vector.extract_strided_slice %0 {offsets = [1, 0], sizes = [31, 32], strides = [1, 1]} : vector<32x32xf32> to vector<31x32xf32>
    %2 = vector.extract_strided_slice %0 {offsets = [0, 0], sizes = [1, 32], strides = [1, 1]} : vector<32x32xf32> to vector<1x32xf32>
    %3 = tpu.concatenate %1, %2 in 0 : vector<31x32xf32>, vector<1x32xf32> -> vector<32x32xf32>
    %4 = vector.extract_strided_slice %0 {offsets = [2, 0], sizes = [30, 32], strides = [1, 1]} : vector<32x32xf32> to vector<30x32xf32>
    %5 = vector.extract_strided_slice %0 {offsets = [0, 0], sizes = [2, 32], strides = [1, 1]} : vector<32x32xf32> to vector<2x32xf32>
    %6 = tpu.concatenate %4, %5 in 0 : vector<30x32xf32>, vector<2x32xf32> -> vector<32x32xf32>
    %7 = vector.extract_strided_slice %0 {offsets = [3, 0], sizes = [29, 32], strides = [1, 1]} : vector<32x32xf32> to vector<29x32xf32>
    %8 = vector.extract_strided_slice %0 {offsets = [0, 0], sizes = [3, 32], strides = [1, 1]} : vector<32x32xf32> to vector<3x32xf32>
    %9 = tpu.concatenate %7, %8 in 0 : vector<29x32xf32>, vector<3x32xf32> -> vector<32x32xf32>
    %10 = vector.extract_strided_slice %0 {offsets = [4, 0], sizes = [28, 32], strides = [1, 1]} : vector<32x32xf32> to vector<28x32xf32>
    %11 = vector.extract_strided_slice %0 {offsets = [0, 0], sizes = [4, 32], strides = [1, 1]} : vector<32x32xf32> to vector<4x32xf32>
    %12 = tpu.concatenate %10, %11 in 0 : vector<28x32xf32>, vector<4x32xf32> -> vector<32x32xf32>
    %13 = tpu.concatenate %0, %3, %6, %9, %12 in 1 : vector<32x32xf32>, vector<32x32xf32>, vector<32x32xf32>, vector<32x32xf32>, vector<32x32xf32> -> vector<32x160xf32>
    %c0_1 = arith.constant 0 : index
    %c0_2 = arith.constant 0 : index
    %14 = vector.load %arg2[%c0_1, %c0_2] : memref<160x168xbf16, #tpu.memory_space<vmem>>, vector<160x168xbf16>
    %15 = arith.truncf %13 : vector<32x160xf32> to vector<32x160xbf16>
    %cst = arith.constant dense<0.000000e+00> : vector<32x168xf32>
    %16 = tpu.matmul %15, %14, %cst {dimension_numbers = #tpu.dot_dimension_numbers<[1], [0], [0], [1], [0, 0, 1, 1], [], []>} : vector<32x160xbf16>, vector<160x168xbf16>, vector<32x168xf32> -> vector<32x168xf32>
    %c0_3 = arith.constant 0 : index
    %c0_4 = arith.constant 0 : index
    %17 = vector.load %arg3[%c0_3, %c0_4] : memref<1x168xf32, #tpu.memory_space<vmem>>, vector<1x168xf32>
    %18 = vector.broadcast %17 : vector<1x168xf32> to vector<32x168xf32>
    %19 = arith.addf %16, %18 : vector<32x168xf32>
    %cst_5 = arith.constant 0.000000e+00 : f32
    %20 = vector.broadcast %cst_5 : f32 to vector<32x168xf32>
    %21 = arith.maximumf %19, %20 : vector<32x168xf32>
    %c0_6 = arith.constant 0 : index
    %c0_7 = arith.constant 0 : index
    %22 = vector.load %arg4[%c0_6, %c0_7] : memref<16x32xbf16, #tpu.memory_space<vmem>>, vector<16x32xbf16>
    %23 = vector.extract_strided_slice %21 {offsets = [1, 0], sizes = [31, 168], strides = [1, 1]} : vector<32x168xf32> to vector<31x168xf32>
    %24 = vector.extract_strided_slice %21 {offsets = [0, 0], sizes = [1, 168], strides = [1, 1]} : vector<32x168xf32> to vector<1x168xf32>
    %25 = tpu.concatenate %23, %24 in 0 : vector<31x168xf32>, vector<1x168xf32> -> vector<32x168xf32>
    %26 = arith.maximumf %21, %25 : vector<32x168xf32>
    %27 = vector.extract_strided_slice %26 {offsets = [0, 1], sizes = [32, 167], strides = [1, 1]} : vector<32x168xf32> to vector<32x167xf32>
    %28 = vector.extract_strided_slice %26 {offsets = [0, 0], sizes = [32, 1], strides = [1, 1]} : vector<32x168xf32> to vector<32x1xf32>
    %29 = tpu.concatenate %27, %28 in 1 : vector<32x167xf32>, vector<32x1xf32> -> vector<32x168xf32>
    %30 = arith.maximumf %26, %29 : vector<32x168xf32>
    %31 = arith.truncf %30 : vector<32x168xf32> to vector<32x168xbf16>
    %cst_8 = arith.constant dense<0.000000e+00> : vector<16x168xf32>
    %32 = tpu.matmul %22, %31, %cst_8 {dimension_numbers = #tpu.dot_dimension_numbers<[1], [0], [0], [1], [0, 0, 1, 1], [], []>} : vector<16x32xbf16>, vector<32x168xbf16>, vector<16x168xf32> -> vector<16x168xf32>
    %33 = vector.extract_strided_slice %32 {offsets = [1, 0], sizes = [15, 168], strides = [1, 1]} : vector<16x168xf32> to vector<15x168xf32>
    %34 = vector.extract_strided_slice %32 {offsets = [0, 0], sizes = [1, 168], strides = [1, 1]} : vector<16x168xf32> to vector<1x168xf32>
    %35 = tpu.concatenate %33, %34 in 0 : vector<15x168xf32>, vector<1x168xf32> -> vector<16x168xf32>
    %36 = vector.extract_strided_slice %32 {offsets = [2, 0], sizes = [14, 168], strides = [1, 1]} : vector<16x168xf32> to vector<14x168xf32>
    %37 = vector.extract_strided_slice %32 {offsets = [0, 0], sizes = [2, 168], strides = [1, 1]} : vector<16x168xf32> to vector<2x168xf32>
    %38 = tpu.concatenate %36, %37 in 0 : vector<14x168xf32>, vector<2x168xf32> -> vector<16x168xf32>
    %39 = vector.extract_strided_slice %32 {offsets = [3, 0], sizes = [13, 168], strides = [1, 1]} : vector<16x168xf32> to vector<13x168xf32>
    %40 = vector.extract_strided_slice %32 {offsets = [0, 0], sizes = [3, 168], strides = [1, 1]} : vector<16x168xf32> to vector<3x168xf32>
    %41 = tpu.concatenate %39, %40 in 0 : vector<13x168xf32>, vector<3x168xf32> -> vector<16x168xf32>
    %42 = vector.extract_strided_slice %32 {offsets = [4, 0], sizes = [12, 168], strides = [1, 1]} : vector<16x168xf32> to vector<12x168xf32>
    %43 = vector.extract_strided_slice %32 {offsets = [0, 0], sizes = [4, 168], strides = [1, 1]} : vector<16x168xf32> to vector<4x168xf32>
    %44 = tpu.concatenate %42, %43 in 0 : vector<12x168xf32>, vector<4x168xf32> -> vector<16x168xf32>
    %45 = tpu.concatenate %32, %35, %38, %41, %44 in 1 : vector<16x168xf32>, vector<16x168xf32>, vector<16x168xf32>, vector<16x168xf32>, vector<16x168xf32> -> vector<16x840xf32>
    %c0_9 = arith.constant 0 : index
    %c0_10 = arith.constant 0 : index
    %46 = vector.load %arg5[%c0_9, %c0_10] : memref<840x160xbf16, #tpu.memory_space<vmem>>, vector<840x160xbf16>
    %47 = arith.truncf %45 : vector<16x840xf32> to vector<16x840xbf16>
    %cst_11 = arith.constant dense<0.000000e+00> : vector<16x160xf32>
    %48 = tpu.matmul %47, %46, %cst_11 {dimension_numbers = #tpu.dot_dimension_numbers<[1], [0], [0], [1], [0, 0, 1, 1], [], []>} : vector<16x840xbf16>, vector<840x160xbf16>, vector<16x160xf32> -> vector<16x160xf32>
    %c0_12 = arith.constant 0 : index
    %c0_13 = arith.constant 0 : index
    %49 = vector.load %arg6[%c0_12, %c0_13] : memref<1x160xf32, #tpu.memory_space<vmem>>, vector<1x160xf32>
    %50 = vector.broadcast %49 : vector<1x160xf32> to vector<16x160xf32>
    %51 = arith.addf %48, %50 : vector<16x160xf32>
    %cst_14 = arith.constant 0.000000e+00 : f32
    %52 = vector.broadcast %cst_14 : f32 to vector<16x160xf32>
    %53 = arith.maximumf %51, %52 : vector<16x160xf32>
    %c0_15 = arith.constant 0 : index
    %c0_16 = arith.constant 0 : index
    %54 = vector.load %arg7[%c0_15, %c0_16] : memref<8x16xbf16, #tpu.memory_space<vmem>>, vector<8x16xbf16>
    %55 = vector.extract_strided_slice %53 {offsets = [1, 0], sizes = [15, 160], strides = [1, 1]} : vector<16x160xf32> to vector<15x160xf32>
    %56 = vector.extract_strided_slice %53 {offsets = [0, 0], sizes = [1, 160], strides = [1, 1]} : vector<16x160xf32> to vector<1x160xf32>
    %57 = tpu.concatenate %55, %56 in 0 : vector<15x160xf32>, vector<1x160xf32> -> vector<16x160xf32>
    %58 = arith.maximumf %53, %57 : vector<16x160xf32>
    %59 = vector.extract_strided_slice %58 {offsets = [0, 1], sizes = [16, 159], strides = [1, 1]} : vector<16x160xf32> to vector<16x159xf32>
    %60 = vector.extract_strided_slice %58 {offsets = [0, 0], sizes = [16, 1], strides = [1, 1]} : vector<16x160xf32> to vector<16x1xf32>
    %61 = tpu.concatenate %59, %60 in 1 : vector<16x159xf32>, vector<16x1xf32> -> vector<16x160xf32>
    %62 = arith.maximumf %58, %61 : vector<16x160xf32>
    %63 = arith.truncf %62 : vector<16x160xf32> to vector<16x160xbf16>
    %cst_17 = arith.constant dense<0.000000e+00> : vector<8x160xf32>
    %64 = tpu.matmul %54, %63, %cst_17 {dimension_numbers = #tpu.dot_dimension_numbers<[1], [0], [0], [1], [0, 0, 1, 1], [], []>} : vector<8x16xbf16>, vector<16x160xbf16>, vector<8x160xf32> -> vector<8x160xf32>
    %65 = vector.extract_strided_slice %64 {offsets = [1, 0], sizes = [7, 160], strides = [1, 1]} : vector<8x160xf32> to vector<7x160xf32>
    %66 = vector.extract_strided_slice %64 {offsets = [0, 0], sizes = [1, 160], strides = [1, 1]} : vector<8x160xf32> to vector<1x160xf32>
    %67 = tpu.concatenate %65, %66 in 0 : vector<7x160xf32>, vector<1x160xf32> -> vector<8x160xf32>
    %68 = vector.extract_strided_slice %64 {offsets = [2, 0], sizes = [6, 160], strides = [1, 1]} : vector<8x160xf32> to vector<6x160xf32>
    %69 = vector.extract_strided_slice %64 {offsets = [0, 0], sizes = [2, 160], strides = [1, 1]} : vector<8x160xf32> to vector<2x160xf32>
    %70 = tpu.concatenate %68, %69 in 0 : vector<6x160xf32>, vector<2x160xf32> -> vector<8x160xf32>
    %71 = vector.extract_strided_slice %64 {offsets = [3, 0], sizes = [5, 160], strides = [1, 1]} : vector<8x160xf32> to vector<5x160xf32>
    %72 = vector.extract_strided_slice %64 {offsets = [0, 0], sizes = [3, 160], strides = [1, 1]} : vector<8x160xf32> to vector<3x160xf32>
    %73 = tpu.concatenate %71, %72 in 0 : vector<5x160xf32>, vector<3x160xf32> -> vector<8x160xf32>
    %74 = vector.extract_strided_slice %64 {offsets = [4, 0], sizes = [4, 160], strides = [1, 1]} : vector<8x160xf32> to vector<4x160xf32>
    %75 = vector.extract_strided_slice %64 {offsets = [0, 0], sizes = [4, 160], strides = [1, 1]} : vector<8x160xf32> to vector<4x160xf32>
    %76 = tpu.concatenate %74, %75 in 0 : vector<4x160xf32>, vector<4x160xf32> -> vector<8x160xf32>
    %77 = tpu.concatenate %64, %67, %70, %73, %76 in 1 : vector<8x160xf32>, vector<8x160xf32>, vector<8x160xf32>, vector<8x160xf32>, vector<8x160xf32> -> vector<8x800xf32>
    %c0_18 = arith.constant 0 : index
    %c0_19 = arith.constant 0 : index
    %78 = vector.load %arg8[%c0_18, %c0_19] : memref<800x120xbf16, #tpu.memory_space<vmem>>, vector<800x120xbf16>
    %79 = arith.truncf %77 : vector<8x800xf32> to vector<8x800xbf16>
    %cst_20 = arith.constant dense<0.000000e+00> : vector<8x120xf32>
    %80 = tpu.matmul %79, %78, %cst_20 {dimension_numbers = #tpu.dot_dimension_numbers<[1], [0], [0], [1], [0, 0, 1, 1], [], []>} : vector<8x800xbf16>, vector<800x120xbf16>, vector<8x120xf32> -> vector<8x120xf32>
    %c0_21 = arith.constant 0 : index
    %c0_22 = arith.constant 0 : index
    %81 = vector.load %arg10[%c0_21, %c0_22] : memref<1x8xbf16, #tpu.memory_space<vmem>>, vector<1x8xbf16>
    %82 = arith.truncf %80 : vector<8x120xf32> to vector<8x120xbf16>
    %cst_23 = arith.constant dense<0.000000e+00> : vector<1x120xf32>
    %83 = tpu.matmul %81, %82, %cst_23 {dimension_numbers = #tpu.dot_dimension_numbers<[1], [0], [0], [1], [0, 0, 1, 1], [], []>} : vector<1x8xbf16>, vector<8x120xbf16>, vector<1x120xf32> -> vector<1x120xf32>
    %c0_24 = arith.constant 0 : index
    %c0_25 = arith.constant 0 : index
    %84 = vector.load %arg9[%c0_24, %c0_25] : memref<1x120xf32, #tpu.memory_space<vmem>>, vector<1x120xf32>
    %85 = arith.addf %83, %84 : vector<1x120xf32>
    %cst_26 = arith.constant 0.000000e+00 : f32
    %86 = vector.broadcast %cst_26 : f32 to vector<1x120xf32>
    %87 = arith.maximumf %85, %86 : vector<1x120xf32>
    %c0_27 = arith.constant 0 : index
    %c0_28 = arith.constant 0 : index
    %88 = vector.load %arg11[%c0_27, %c0_28] : memref<120x84xbf16, #tpu.memory_space<vmem>>, vector<120x84xbf16>
    %89 = arith.truncf %87 : vector<1x120xf32> to vector<1x120xbf16>
    %cst_29 = arith.constant dense<0.000000e+00> : vector<1x84xf32>
    %90 = tpu.matmul %89, %88, %cst_29 {dimension_numbers = #tpu.dot_dimension_numbers<[1], [0], [0], [1], [0, 0, 1, 1], [], []>} : vector<1x120xbf16>, vector<120x84xbf16>, vector<1x84xf32> -> vector<1x84xf32>
    %c0_30 = arith.constant 0 : index
    %c0_31 = arith.constant 0 : index
    %91 = vector.load %arg12[%c0_30, %c0_31] : memref<1x84xf32, #tpu.memory_space<vmem>>, vector<1x84xf32>
    %92 = arith.addf %90, %91 : vector<1x84xf32>
    %cst_32 = arith.constant 0.000000e+00 : f32
    %93 = vector.broadcast %cst_32 : f32 to vector<1x84xf32>
    %94 = arith.maximumf %92, %93 : vector<1x84xf32>
    %c0_33 = arith.constant 0 : index
    %c0_34 = arith.constant 0 : index
    %95 = vector.load %arg13[%c0_33, %c0_34] : memref<84x128xbf16, #tpu.memory_space<vmem>>, vector<84x128xbf16>
    %96 = arith.truncf %94 : vector<1x84xf32> to vector<1x84xbf16>
    %cst_35 = arith.constant dense<0.000000e+00> : vector<1x128xf32>
    %97 = tpu.matmul %96, %95, %cst_35 {dimension_numbers = #tpu.dot_dimension_numbers<[1], [0], [0], [1], [0, 0, 1, 1], [], []>} : vector<1x84xbf16>, vector<84x128xbf16>, vector<1x128xf32> -> vector<1x128xf32>
    %c0_36 = arith.constant 0 : index
    %c0_37 = arith.constant 0 : index
    %98 = vector.load %arg14[%c0_36, %c0_37] : memref<1x128xf32, #tpu.memory_space<vmem>>, vector<1x128xf32>
    %99 = arith.addf %97, %98 : vector<1x128xf32>
    %c0_38 = arith.constant 0 : index
    %c0_39 = arith.constant 0 : index
    %c0_40 = arith.constant 0 : index
    %100 = vector.load %arg15[%c0_38, %c0_39, %c0_40] : memref<1x1x128xf32, #tpu.memory_space<vmem>>, vector<1x1x128xf32>
    %101 = vector.shape_cast %100 : vector<1x1x128xf32> to vector<1x128xf32>
    %102 = vector.shape_cast %99 : vector<1x128xf32> to vector<1x1x128xf32>
    tpu.vector_store %arg15[%c0_38, %c0_39, %c0_40], %102 {strides = array<i32>} : memref<1x1x128xf32, #tpu.memory_space<vmem>>, vector<1x1x128xf32>,
    return
  }
  func.func @transform_0(%arg0: i32) -> (i32, i32) {
    %c0_i32 = arith.constant 0 : i32
    %c0_i32_0 = arith.constant 0 : i32
    return %arg0, %c0_i32 : i32, i32
  }
  func.func @transform_1(%arg0: i32) -> (i32, i32) {
    %c0_i32 = arith.constant 0 : i32
    %c0_i32_0 = arith.constant 0 : i32
    %c0_i32_1 = arith.constant 0 : i32
    return %c0_i32, %c0_i32_0 : i32, i32
  }
  func.func @transform_2(%arg0: i32) -> (i32, i32) {
    %c0_i32 = arith.constant 0 : i32
    %c0_i32_0 = arith.constant 0 : i32
    %c0_i32_1 = arith.constant 0 : i32
    return %c0_i32, %c0_i32_0 : i32, i32
  }
  func.func @transform_3(%arg0: i32) -> (i32, i32) {
    %c0_i32 = arith.constant 0 : i32
    %c0_i32_0 = arith.constant 0 : i32
    %c0_i32_1 = arith.constant 0 : i32
    return %c0_i32, %c0_i32_0 : i32, i32
  }
  func.func @transform_4(%arg0: i32) -> (i32, i32) {
    %c0_i32 = arith.constant 0 : i32
    %c0_i32_0 = arith.constant 0 : i32
    %c0_i32_1 = arith.constant 0 : i32
    return %c0_i32, %c0_i32_0 : i32, i32
  }
  func.func @transform_5(%arg0: i32) -> (i32, i32) {
    %c0_i32 = arith.constant 0 : i32
    %c0_i32_0 = arith.constant 0 : i32
    %c0_i32_1 = arith.constant 0 : i32
    return %c0_i32, %c0_i32_0 : i32, i32
  }
  func.func @transform_6(%arg0: i32) -> (i32, i32) {
    %c0_i32 = arith.constant 0 : i32
    %c0_i32_0 = arith.constant 0 : i32
    %c0_i32_1 = arith.constant 0 : i32
    return %c0_i32, %c0_i32_0 : i32, i32
  }
  func.func @transform_7(%arg0: i32) -> (i32, i32) {
    %c0_i32 = arith.constant 0 : i32
    %c0_i32_0 = arith.constant 0 : i32
    %c0_i32_1 = arith.constant 0 : i32
    return %c0_i32, %c0_i32_0 : i32, i32
  }
  func.func @transform_8(%arg0: i32) -> (i32, i32) {
    %c0_i32 = arith.constant 0 : i32
    %c0_i32_0 = arith.constant 0 : i32
    %c0_i32_1 = arith.constant 0 : i32
    return %c0_i32, %c0_i32_0 : i32, i32
  }
  func.func @transform_9(%arg0: i32) -> (i32, i32) {
    %c0_i32 = arith.constant 0 : i32
    %c0_i32_0 = arith.constant 0 : i32
    %c0_i32_1 = arith.constant 0 : i32
    return %c0_i32, %c0_i32_0 : i32, i32
  }
  func.func @transform_10(%arg0: i32) -> (i32, i32) {
    %c0_i32 = arith.constant 0 : i32
    %c0_i32_0 = arith.constant 0 : i32
    %c0_i32_1 = arith.constant 0 : i32
    return %c0_i32, %c0_i32_0 : i32, i32
  }
  func.func @transform_11(%arg0: i32) -> (i32, i32) {
    %c0_i32 = arith.constant 0 : i32
    %c0_i32_0 = arith.constant 0 : i32
    %c0_i32_1 = arith.constant 0 : i32
    return %c0_i32, %c0_i32_0 : i32, i32
  }
  func.func @transform_12(%arg0: i32) -> (i32, i32) {
    %c0_i32 = arith.constant 0 : i32
    %c0_i32_0 = arith.constant 0 : i32
    %c0_i32_1 = arith.constant 0 : i32
    return %c0_i32, %c0_i32_0 : i32, i32
  }
  func.func @transform_13(%arg0: i32) -> (i32, i32) {
    %c0_i32 = arith.constant 0 : i32
    %c0_i32_0 = arith.constant 0 : i32
    %c0_i32_1 = arith.constant 0 : i32
    return %c0_i32, %c0_i32_0 : i32, i32
  }
  func.func @transform_14(%arg0: i32) -> (i32, i32, i32) {
    %c0_i32 = arith.constant 0 : i32
    %c0_i32_0 = arith.constant 0 : i32
    %c0_i32_1 = arith.constant 0 : i32
    return %arg0, %c0_i32, %c0_i32_0 : i32, i32, i32
  }
}

</mosaic_0001>

<bundles_post_ra>
// kernel: net_forward.1
= control target key start
LH: loop header
LB: loop body
LE: loop exit
PB: predicated region body
PF: predicated region fallthrough
CT: control target
= control target key end

     0   :  { %19 = vsyncpa [#allocation3], 0  ;;  %s4864_s0 = inlined_call_operand.vmem [shape: f32[64,32], index: 0, kind: input, shape index: {}]   ;;  %s4865_s1 = inlined_call_operand.vmem [shape: bf16[160,168], index: 1, kind: input, shape index: {}]   ;;  %s4866_s2 = inlined_call_operand.vmem [shape: f32[1,168], index: 2, kind: input, shape index: {}]   ;;  %s4867_s3 = inlined_call_operand.vmem [shape: bf16[16,32], index: 3, kind: input, shape index: {}]   ;;  %s4868_s4 = inlined_call_operand.vmem [shape: bf16[840,160], index: 4, kind: input, shape index: {}]   ;;  %s4869_s5 = inlined_call_operand.vmem [shape: f32[1,160], index: 5, kind: input, shape index: {}]   ;;  %s4870_s6 = inlined_call_operand.vmem [shape: bf16[8,16], index: 6, kind: input, shape index: {}]   ;;  %s4871_s7 = inlined_call_operand.vmem [shape: bf16[800,120], index: 7, kind: input, shape index: {}]   ;;  %s4872_s8 = inlined_call_operand.vmem [shape: f32[1,120], index: 8, kind: input, shape index: {}]   ;;  %s4873_s9 = inlined_call_operand.vmem [shape: bf16[1,8], index: 9, kind: input, shape index: {}]   ;;  %s4874_s10 = inlined_call_operand.vmem [shape: bf16[120,84], index: 10, kind: input, shape index: {}]   ;;  %s4875_s11 = inlined_call_operand.vmem [shape: f32[1,84], index: 11, kind: input, shape index: {}]   ;;  %s4876_s12 = inlined_call_operand.vmem [shape: bf16[84,128], index: 12, kind: input, shape index: {}]   ;;  %s4877_s13 = inlined_call_operand.vmem [shape: f32[1,128], index: 13, kind: input, shape index: {}]   ;;  %s4878_s14 = inlined_call_operand.hbm [shape: f32[2,1,128], index: 14, kind: output, shape index: {}]  }
   0x1   :  { %21 = vsyncpa [#allocation3 + $0x1], 0  ;;  %s3894_s29 = smov 0   ;;  %s3896_s30 = smov 0  }
   0x2   :  { %s3898_s15 = smov 0   ;;  %s3900_s16 = smov 0  }
   0x3 LB: > { %4887 = sst [smem:[#allocation5_spill]] %s3792_s29  ;;  %s3915_s17 = sadd.s32 4294967295, %s3804_s16   ;;  %s3804_s16 = sphi %s3900_s16, %s4898_s16   ;;  %s3800_s15 = sphi %s3898_s15, %s4900_s15   ;;  %s3796_s30 = sphi %s3896_s30, %s4902_s30   ;;  %s3792_s29 = sphi %s3894_s29, %s4901_s29  }
   0x4   : > { %4888 = sst [smem:[#allocation6_spill]] %s3800_s15  ;;  %s2955_s18 = sadd.s32 4294967294, %s3804_s16  }
   0x5   : > { %s3919_s19 = sadd.s32 1, %s3804_s16   ;;  %s333_s20 = sadd.s32 1, %s3800_s15 }
   0x6   : > { %4889 = sst [smem:[#allocation7_spill]] %s3919_s19  ;;  %s330_s21 = ssub.s32 %s3804_s16, %s3919_s19 }
   0x7   : > { %p343_p0 = scmp.ne.s32.totalorder %s3800_s15, %s3796_s30  ;;  %p331_p1 = scmp.eq.s32.totalorder %s330_s21, 0 }
   0x8   : > { %p344_p2 = scmp.eq.s32.totalorder %s3915_s17, 1  ;;  %p349_p3 = scmp.ne.s32.totalorder %s3796_s30, %s3792_s29 }
   0x9   : > { %p350_p4 = scmp.eq.s32.totalorder %s2955_s18, 1  ;;  %p2958_p7 = scmp.ge.s32.totalorder %s3804_s16, 1 }
   0xa   : > { %s3930_s22 = scalar_select %p331_p1, %s3800_s15, %s333_s20  }
   0xb   : > { %p3932_p5 = por %p344_p2, %p343_p0  ;;  %p3936_p6 = por %p350_p4, %p349_p3 }
   0xc   : > { %4890 = sst [smem:[#allocation8_spill]] %s3930_s22  ;;  %p416_p8 = scmp.lt.s32.totalorder %s3804_s16, 3 }
   0xd   : > { %s4892_s24 = scalar_select %p3936_p6, 1, 0 }
   0xe   : > { %p417_p9 = pnand %p2958_p7, %p416_p8 }
   0xf   : > { %4893 = sst [smem:[#allocation9_spill]] %s4892_s24  ;;  %s2959_s25 = sshll.u32 (!%p417_p9), %s3915_s17, 2  ;;  %v3489_v0 = vld [vmem:[%s4865_s1 + $0x4] ss:$8 sps:$4 sm:$0xff] (!%p417_p9)   ;;  %v3491_v1 = vld [vmem:[%s4865_s1] ss:$8 sps:$4 sm:$0xff] (!%p417_p9)  }
  0x10   : > { %420 = sbr.rel (%p417_p9) target bundleno = 2654 (0xa5e), region = 76  ;;  %p462_p10 = scmp.lt.s32.totalorder (!%p417_p9), %s2959_s25, 7  ;;  %v3492_v2 = vld [vmem:[%s4865_s1 + $0x14] ss:$8 sps:$4 sm:$0xff] (!%p417_p9)   ;;  %719 = vmatprep.subr.bf16.mxu0 (!%p417_p9), %v3489_v0  ;;  %v3494_v3 = vld [vmem:[%s4865_s1 + $0x10] ss:$8 sps:$4 sm:$0xff] (!%p417_p9)  }
  0x11   : > { %720 = vmatpush1.bf16.msra.mxu0 (!%p417_p9), %v3491_v1  ;;  %v3495_v4 = vld [vmem:[%s4865_s1 + $0x24] ss:$8 sps:$4 sm:$0xff] (!%p417_p9)   ;;  %v3497_v5 = vld [vmem:[%s4865_s1 + $0x20] ss:$8 sps:$4 sm:$0xff] (!%p417_p9)   ;;  %vm476_vm0 = vcmask (!%p417_p9), 1046528   ;;  %vm498_vm1 = vcmask (!%p417_p9), 1044480  }
  0x12   : > { %721 = vmatprep.subr.bf16.mxu0 (!%p417_p9), %v3492_v2  ;;  %vm487_vm2 = vcmask (!%p417_p9), 1045504   ;;  %v3498_v18 = vld [vmem:[%s4865_s1 + $0x34] ss:$8 sps:$4 sm:$0xff] (!%p417_p9)   ;;  %v3500_v31 = vld [vmem:[%s4865_s1 + $0x30] ss:$8 sps:$4 sm:$0xff] (!%p417_p9)   ;;  %s3806_s24 = smov (!%p417_p9), 32  }
  0x13   : > { %v3501_v35 = vld [vmem:[%s4865_s1 + $0x44] ss:$8 sps:$4 sm:$0xff] (!%p417_p9)   ;;  %vm509_vm3 = vcmask (!%p417_p9), 1043456   ;;  %s4884_s26 = smov (!%p417_p9), 96   ;;  %v3503_v43 = vld [vmem:[%s4865_s1 + $0x40] ss:$8 sps:$4 sm:$0xff] (!%p417_p9)  }
  0x14   : > { %v3504_v44 = vld [vmem:[%s4865_s1 + $0x54] ss:$8 sps:$4 sm:$0xff] (!%p417_p9)   ;;  %s4886_s29 = smov (!%p417_p9), 64   ;;  %v3506_v50 = vld [vmem:[%s4865_s1 + $0x50] ss:$8 sps:$4 sm:$0xff] (!%p417_p9)   ;;  %vm562_vm4 = vcmask (!%p417_p9), 261120  }
  0x15   : > { %722 = vmatpush1.bf16.msra.mxu0 (!%p417_p9), %v3494_v3  ;;  %v3507_v52 = vld [vmem:[%s4865_s1 + $0x64] ss:$8 sps:$4 sm:$0xff] (!%p417_p9)   ;;  %v3509_v57 = vld [vmem:[%s4865_s1 + $0x60] ss:$8 sps:$4 sm:$0xff] (!%p417_p9)   ;;  %v3510_v58 = vld [vmem:[%s4865_s1 + $0x74] ss:$8 sps:$4 sm:$0xff] (!%p417_p9)  }
  0x16   : > { %723 = vmatprep.subr.bf16.mxu0 (!%p417_p9), %v3495_v4  ;;  %v3512_v59 = vld [vmem:[%s4865_s1 + $0x70] ss:$8 sps:$4 sm:$0xff] (!%p417_p9)   ;;  %v3513_v60 = vld [vmem:[%s4865_s1 + $0x84] ss:$8 sps:$4 sm:$0xff] (!%p417_p9)   ;;  %v3515_v61 = vld [vmem:[%s4865_s1 + $0x80] ss:$8 sps:$4 sm:$0xff] (!%p417_p9)  }
  0x17   : > { %s4904_s25 = smov (!%p462_p10, %s2959_s25), 7  ;;  %v3516_v62 = vld [vmem:[%s4865_s1 + $0x94] ss:$8 sps:$4 sm:$0xff]   ;;  %v3518_v63 = vld [vmem:[%s4865_s1 + $0x90] ss:$8 sps:$4 sm:$0xff]   ;;  %vm567_vm5 = vcmask 523264  }
  0x18   : > { %s2960_s19 = sshll.u32 %s4904_s25, 3  ;;  %vm572_vm6 = vcmask 785408   ;;  %s3809_s15 = smov 127   ;;  %vm873_vm7 = vcmask 318464   ;;  %vm848_vm8 = vcmask 1039360   ;;  %vm1003_vm9 = vcmask 326656  }
  0x19   : > { %s465_s18 = scalar_lea.vmem %s4864_s0, %s2960_s19  ;;  %724 = vmatpush1.bf16.msra.mxu0 %v3497_v5  ;;  %s3810_s19 = smov 39   ;;  %vm1020_vm10 = vcmask 654336   ;;  %vm1037_vm11 = vcmask 982016   ;;  %vm1719_vm12 = vcmask 588800   ;;  %vm1952_vm13 = vcmask 252928  }
  0x1a   : > { %v3964_v6 = vld [vmem:[%s465_s18] sm:$0xff]  ;;  %v3966_v7 = vld [vmem:[%s465_s18 + $0x8] sm:$0xff]  ;;  %v3968_v8 = vld [vmem:[%s465_s18 + $0x10] sm:$0xff]  ;;  %725 = vmatprep.subr.bf16.mxu0 %v3498_v18  ;;  %s3813_s22 = smov 80   ;;  %s3815_s20 = smov 31   ;;  %vm1961_vm14 = vcmask 130048  }
  0x1b   : > { %v477_v9 = vrot.slane %v3964_v6, 1  ;;  %v478_v10 = vrot.slane %v3966_v7, 1  ;;  %v480_v11 = vrot.slane %v3968_v8, 1  ;;  %v499_v12 = vrot.slane %v3964_v6, 3  ;;  %v3974_v13 = vld [vmem:[%s465_s18 + $0x18] sm:$0xff]  ;;  %s4895_s25 = smov 96  }
  0x1c   : > { %v500_v14 = vrot.slane %v3966_v7, 3  ;;  %v502_v15 = vrot.slane %v3968_v8, 3  ;;  %v488_v16 = vrot.slane %v3964_v6, 2  ;;  %v489_v17 = vrot.slane %v3966_v7, 2  ;;  %s459_s18 = sand.u32 1, %s3796_s30  }
  0x1d   : > { %v479_v19 = vsel %vm476_vm0, %v477_v9, %v478_v10  ;;  %v481_v20 = vsel %vm476_vm0, %v478_v10, %v480_v11  ;;  %v491_v21 = vrot.slane %v3968_v8, 2  ;;  %v482_v22 = vrot.slane %v3974_v13, 1  ;;  %726 = vmatpush1.bf16.msra.mxu0 %v3500_v31  ;;  %s2888_s27 = scalar_lea.sflag [#allocation3], %s459_s18 }
  0x1e   : > { %v3369_v23 = vpack.i.bf16 %v481_v20, %v479_v19  ;;  %v501_v24 = vsel %vm498_vm1, %v499_v12, %v500_v14  ;;  %v503_v25 = vsel %vm498_vm1, %v500_v14, %v502_v15  ;;  %v490_v26 = vsel %vm487_vm2, %v488_v16, %v489_v17  ;;  %727 = vmatprep.subr.bf16.mxu0 %v3501_v35  ;;  %v601_v35 = vld [vmem:[%s4866_s2] sm:$0x3] }
  0x1f   : > { %v3379_v27 = vpack.i.bf16 %v503_v25, %v501_v24  ;;  %v492_v28 = vsel %vm487_vm2, %v489_v17, %v491_v21  ;;  %v483_v29 = vsel %vm476_vm0, %v480_v11, %v482_v22  ;;  %v486_v30 = vsel %vm476_vm0, %v482_v22, %v477_v9 }
  0x20   : > { %3370 = vrot.lane.b32.xlu0 %v3369_v23, %s3806_s24  ;;  %v3374_v32 = vpack.i.bf16 %v492_v28, %v490_v26  ;;  %v493_v33 = vrot.slane %v3974_v13, 2  ;;  %v504_v34 = vrot.slane %v3974_v13, 3  ;;  %v3384_v36 = vpack.i.bf16 %v486_v30, %v483_v29 }
  0x21   : > { %3380 = vrot.lane.b32.xlu1 %v3379_v27, %s4884_s26  ;;  %v510_v37 = vrot.slane %v3964_v6, 4  ;;  %v511_v38 = vrot.slane %v3966_v7, 4  ;;  %v513_v46 = vrot.slane %v3968_v8, 4  ;;  %v515_v48 = vrot.slane %v3974_v13, 4  ;;  %728 = vmatpush1.bf16.msra.mxu0 %v3503_v43 }
  0x22   : > { %v494_v39 = vsel %vm487_vm2, %v491_v21, %v493_v33  ;;  %v497_v40 = vsel %vm487_vm2, %v493_v33, %v488_v16  ;;  %v505_v41 = vsel %vm498_vm1, %v502_v15, %v504_v34  ;;  %v508_v42 = vsel %vm498_vm1, %v504_v34, %v499_v12  ;;  %729 = vmatprep.subr.bf16.mxu0 %v3504_v44 }
  0x23   : > { %v512_v45 = vsel %vm509_vm3, %v510_v37, %v511_v38  ;;  %v3389_v47 = vpack.i.bf16 %v497_v40, %v494_v39  ;;  %v3394_v49 = vpack.i.bf16 %v508_v42, %v505_v41  ;;  %v514_v51 = vsel %vm509_vm3, %v511_v38, %v513_v46 }
  0x24   : > { %3375 = vrot.lane.b32.xlu0 %v3374_v32, %s4886_s29  ;;  %v598_v53 = vpack.c.bf16 %v514_v51, %v512_v45  ;;  %v516_v54 = vsel %vm509_vm3, %v513_v46, %v515_v48  ;;  %v522_v55 = vsel %vm509_vm3, %v515_v48, %v510_v37  ;;  %v603_v32 = vlaneseq }
  0x25   : > { %3385 = vrot.lane.b32.xlu1 %v3384_v36, %s3806_s24  ;;  %v600_v56 = vpack.c.bf16 %v522_v55, %v516_v54  ;;  %730 = vmatpush1.bf16.msra.mxu0 %v3506_v50  ;;  %vm3817_vm15 = vmmov 0  }
  0x26   : > { %2981 = vmatprep.mubr.msk.bf16.mxu0 %vm562_vm4, %v598_v53  ;;  %731 = vmatprep.subr.bf16.mxu0 %v3507_v52  ;;  %v4070_v33 = vshrl.u32 %v603_v32, 7 }
  0x28   : > { %3390 = vrot.lane.b32.xlu0 %v3389_v47, %s4886_s29  ;;  %v605_v34 = vsub.s32 0, %v4070_v33  ;;  %v609_v36 = vsub.s32 1, %v4070_v33  ;;  %s3814_s29 = smov 120  }
  0x29   : > { %3395 = vrot.lane.b32.xlu1 %v3394_v49, %s4884_s26  ;;  %732 = vmatpush1.bf16.msra.mxu0 %v3509_v57 }
  0x2a   : > { %733 = vmatprep.subr.bf16.mxu0 %v3510_v58  ;;  %v606_v37 = vrot.slane %v601_v35, %v605_v34  ;;  %v610_v38 = vrot.slane %v601_v35, %v609_v36 }
  0x2d   : > { %734 = vmatpush1.bf16.msra.mxu0 %v3512_v59 }
  0x2e   : > { %735 = vmatprep.subr.bf16.mxu0 %v3513_v60 }
  0x31   : > { %736 = vmatpush1.bf16.msra.mxu0 %v3515_v61 }
  0x32   : > { %737 = vmatprep.subr.bf16.mxu0 %v3516_v62 }
  0x35   : > { %738 = vmatpush1.bf16.msra.mxu0 %v3518_v63 }
  0x92   : > { %v3371_v0 = vpop.permute.xlu0 %3370 }
  0x93   : > { %v3381_v1 = vpop.permute.xlu1 %3380  ;;  %v3373_v2 = vunpack.i.h.bf16 %v3371_v0  ;;  %v3372_v3 = vunpack.i.l.bf16 %v3371_v0 }
  0x94   : > { %v3383_v4 = vunpack.i.h.bf16 %v3381_v1  ;;  %v3382_v5 = vunpack.i.l.bf16 %v3381_v1 }
  0x95   : > { %v564_v14 = vsel %vm562_vm4, %v3966_v7, %v3373_v2  ;;  %v563_v15 = vsel %vm562_vm4, %v3964_v6, %v3372_v3 }
  0x96   : > { %v3376_v9 = vpop.permute.xlu0 %3375 }
  0x97   : > { %v3378_v10 = vunpack.i.h.bf16 %v3376_v9  ;;  %v3377_v11 = vunpack.i.l.bf16 %v3376_v9  ;;  %v3386_v12 = vpop.permute.xlu1 %3385 }
  0x98   : > { %v3388_v16 = vunpack.i.h.bf16 %v3386_v12  ;;  %v3387_v17 = vunpack.i.l.bf16 %v3386_v12 }
  0x99   : > { %v568_v18 = vsel %vm567_vm5, %v563_v15, %v3377_v11  ;;  %v569_v19 = vsel %vm567_vm5, %v564_v14, %v3378_v10 }
  0x9a   : > { %v566_v20 = vsel %vm562_vm4, %v3974_v13, %v3388_v16  ;;  %v565_v21 = vsel %vm562_vm4, %v3968_v8, %v3387_v17  ;;  %v3391_v22 = vpop.permute.xlu0 %3390  ;;  %v573_v23 = vsel %vm572_vm6, %v568_v18, %v3382_v5  ;;  %v574_v7 = vsel %vm572_vm6, %v569_v19, %v3383_v4 }
  0x9b   : > { %v3393_v24 = vunpack.i.h.bf16 %v3391_v22  ;;  %v3392_v25 = vunpack.i.l.bf16 %v3391_v22  ;;  %v3396_v6 = vpop.permute.xlu1 %3395  ;;  %v597_v26 = vpack.c.bf16 %v574_v7, %v573_v23 }
  0x9c   : > { %v3398_v27 = vunpack.i.h.bf16 %v3396_v6  ;;  %v3397_v28 = vunpack.i.l.bf16 %v3396_v6 }
  0x9d   : > { %v571_v29 = vsel %vm567_vm5, %v566_v20, %v3393_v24  ;;  %v570_v30 = vsel %vm567_vm5, %v565_v21, %v3392_v25  ;;  %752 = vmatmul.mubr.bf16.vlgmr.msra.gmra.mrb[0].mxu0 %v597_v26 }
  0x9e   : > { %2982 = vmatprep.mubr.msk.bf16.mxu0 %vm562_vm4, %v600_v56  ;;  %v575_v8 = vsel %vm572_vm6, %v570_v30, %v3397_v28  ;;  %v576_v13 = vsel %vm572_vm6, %v571_v29, %v3398_v27  ;;  %v3811_v28 = vmov 0  }
  0x9f   : > { %v599_v31 = vpack.c.bf16 %v576_v13, %v575_v8  ;;  %930 = vmatprep.mubr.bf16.mxu1 %v3811_v28 }
  0xa5   : > { %762 = vmatmul.mubr.bf16.gmra.mrb[4].mxu0 %v599_v31 }
  0xa6   : > { %1997 = vmatprep.mubr.bf16.mxu0 %v3811_v28 }
 0x170   : > { %v753_v39 = vpop.f32.mrb[0].mxu0 }
 0x171   : > { %v754_v40 = vadd.f32 %v753_v39, %v606_v37  ;;  %v755_v41 = vpop.f32.mrb[1].mxu0 }
 0x172   : > { %v756_v42 = vadd.f32 %v755_v41, %v610_v38  ;;  %v757_v43 = vpop.f32.mrb[2].mxu0 }
 0x173   : > { %v772_v44 = vmax.f32 %v754_v40, 0.0  ;;  %v758_v45 = vadd.f32 %v757_v43, %v606_v37  ;;  %v759_v46 = vpop.f32.mrb[3].mxu0 }
 0x174   : > { %v773_v47 = vmax.f32 %v756_v42, 0.0  ;;  %v760_v48 = vadd.f32 %v759_v46, %v610_v38 }
 0x175   : > { %v774_v49 = vmax.f32 %v758_v45, 0.0  ;;  %v790_v51 = vrot.slane %v772_v44, 1 }
 0x176   : > { %v775_v50 = vmax.f32 %v760_v48, 0.0  ;;  %v793_v53 = vrot.slane %v773_v47, 1 }
 0x177   : > { %v791_v52 = vrot.slane %v774_v49, 1 }
 0x178   : > { %v794_v54 = vrot.slane %v775_v50, 1  ;;  %v763_v55 = vpop.f32.mrb[4].mxu0 }
 0x179   : > { %v792_v56 = vsel %vm476_vm0, %v790_v51, %v791_v52  ;;  %v764_v57 = vadd.f32 %v763_v55, %v606_v37  ;;  %v765_v58 = vpop.f32.mrb[5].mxu0 }
 0x17a   : > { %v766_v59 = vadd.f32 %v765_v58, %v610_v38  ;;  %v767_v60 = vpop.f32.mrb[6].mxu0  ;;  %v4082_v61 = vmax.f32 %v772_v44, %v792_v56  ;;  %v795_v62 = vsel %vm476_vm0, %v793_v53, %v794_v54 }
 0x17b   : > { %v776_v63 = vmax.f32 %v764_v57, 0.0  ;;  %v768_v0 = vadd.f32 %v767_v60, %v606_v37  ;;  %v769_v1 = vpop.f32.mrb[7].mxu0  ;;  %v4085_v2 = vmax.f32 %v773_v47, %v795_v62 }
 0x17c   : > { %v777_v3 = vmax.f32 %v766_v59, 0.0  ;;  %v770_v4 = vadd.f32 %v769_v1, %v610_v38 }
 0x17d   : > { %v796_v5 = vrot.slane %v776_v63, 1  ;;  %v778_v9 = vmax.f32 %v768_v0, 0.0 }
 0x17e   : > { %v798_v10 = vrot.slane %v777_v3, 1  ;;  %v779_v11 = vmax.f32 %v770_v4, 0.0 }
 0x17f   : > { %v797_v12 = vsel %vm476_vm0, %v791_v52, %v796_v5  ;;  %v800_v14 = vrot.slane %v778_v9, 1 }
 0x180   : > { %v802_v15 = vrot.slane %v779_v11, 1  ;;  %v818_v16 = vmax.f32 %v774_v49, %v797_v12  ;;  %v799_v17 = vsel %vm476_vm0, %v794_v54, %v798_v10  ;;  %v3523_v12 = vld [vmem:[%s4868_s4 + $0x10] ss:$8 sps:$4 sm:$0xff]  }
 0x181   : > { %v801_v18 = vsel %vm476_vm0, %v796_v5, %v800_v14  ;;  %v814_v19 = vsel %vm476_vm0, %v800_v14, %v790_v51  ;;  %v819_v20 = vmax.f32 %v775_v50, %v799_v17  ;;  %v3519_v5 = vld [vmem:[%s4867_s3] sm:$0xff]   ;;  %v3529_v17 = vld [vmem:[%s4868_s4 + $0x30] ss:$8 sps:$4 sm:$0xff]  }
 0x182   : > { %v4091_v21 = vmax.f32 %v778_v9, %v814_v19  ;;  %v815_v22 = vsel %vm476_vm0, %v802_v15, %v793_v53  ;;  %v3404_v23 = vpack.i.bf16 %v818_v16, %v4082_v61  ;;  %v803_v24 = vsel %vm476_vm0, %v798_v10, %v802_v15  ;;  %v3520_v9 = vld [vmem:[%s4868_s4] ss:$8 sps:$4 sm:$0xff]   ;;  %v3522_v10 = vld [vmem:[%s4868_s4 + $0x4] ss:$8 sps:$4 sm:$0xff]  }
 0x183   : > { %v823_v7 = vmax.f32 %v779_v11, %v815_v22  ;;  %v820_v25 = vmax.f32 %v776_v63, %v801_v18  ;;  %v821_v6 = vmax.f32 %v777_v3, %v803_v24  ;;  %v3409_v26 = vpack.i.bf16 %v819_v20, %v4085_v2  ;;  %v3525_v11 = vld [vmem:[%s4868_s4 + $0x14] ss:$8 sps:$4 sm:$0xff]   ;;  %v3528_v14 = vld [vmem:[%s4868_s4 + $0x24] ss:$8 sps:$4 sm:$0xff]   ;;  %v3526_v15 = vld [vmem:[%s4868_s4 + $0x20] ss:$8 sps:$4 sm:$0xff]  }
 0x184   : > { %3405 = vrot.lane.b32.xlu0 %v3404_v23, %s3809_s15  ;;  %3400 = vrot.lane.b32.xlu1 %v3404_v23, %s3810_s19  ;;  %v3534_v18 = vld [vmem:[%s4868_s4 + $0x44] ss:$8 sps:$4 sm:$0xff]   ;;  %v3532_v19 = vld [vmem:[%s4868_s4 + $0x40] ss:$8 sps:$4 sm:$0xff]  }
 0x185   : > { %v3419_v27 = vpack.i.bf16 %v823_v7, %v821_v6  ;;  %v3414_v29 = vpack.i.bf16 %v4091_v21, %v820_v25  ;;  %v3540_v22 = vld [vmem:[%s4868_s4 + $0x64] ss:$8 sps:$4 sm:$0xff]   ;;  %v3538_v23 = vld [vmem:[%s4868_s4 + $0x60] ss:$8 sps:$4 sm:$0xff]   ;;  %v3541_v24 = vld [vmem:[%s4868_s4 + $0x70] ss:$8 sps:$4 sm:$0xff]  }
 0x188   : > { %3410 = vrot.lane.b32.xlu0 %v3409_v26, %s3809_s15  ;;  %3420 = vrot.lane.b32.xlu1 %v3419_v27, %s3809_s15  ;;  %v3549_v26 = vld [vmem:[%s4868_s4 + $0x94] ss:$8 sps:$4 sm:$0xff]   ;;  %v3547_v27 = vld [vmem:[%s4868_s4 + $0x90] ss:$8 sps:$4 sm:$0xff]  }
 0x18c   : > { %3415 = vrot.lane.b32.xlu0 %v3414_v29, %s3810_s19  ;;  %3425 = vrot.lane.b32.xlu1 %v3414_v29, %s3809_s15  ;;  %v3552_v29 = vld [vmem:[%s4868_s4 + $0xa4] ss:$8 sps:$4 sm:$0xff]   ;;  %s3812_s19 = smov 40  }
 0x1f6   : > { %v3406_v30 = vpop.permute.xlu0 %3405  ;;  %v3401_v8 = vpop.permute.xlu1 %3400 }
 0x1f7   : > { %v3408_v13 = vunpack.i.h.bf16 %v3406_v30  ;;  %v3407_v31 = vunpack.i.l.bf16 %v3406_v30  ;;  %v3403_v37 = vunpack.i.h.bf16 %v3401_v8  ;;  %v3402_v38 = vunpack.i.l.bf16 %v3401_v8  ;;  %v3550_v30 = vld [vmem:[%s4868_s4 + $0xa0] ss:$8 sps:$4 sm:$0xff]   ;;  %v3555_v8 = vld [vmem:[%s4868_s4 + $0xb4] ss:$8 sps:$4 sm:$0xff]  }
 0x1fa   : > { %v3411_v32 = vpop.permute.xlu0 %3410  ;;  %v3421_v35 = vpop.permute.xlu1 %3420 }
 0x1fb   : > { %v3413_v39 = vunpack.i.h.bf16 %v3411_v32  ;;  %v3412_v40 = vunpack.i.l.bf16 %v3411_v32  ;;  %v3423_v41 = vunpack.i.h.bf16 %v3421_v35  ;;  %v3422_v42 = vunpack.i.l.bf16 %v3421_v35  ;;  %v3556_v32 = vld [vmem:[%s4868_s4 + $0xc0] ss:$8 sps:$4 sm:$0xff]   ;;  %v3561_v35 = vld [vmem:[%s4868_s4 + $0xd4] ss:$8 sps:$4 sm:$0xff]  }
 0x1fd   : > { %v874_v43 = vsel %vm873_vm7, %v3412_v40, %v3402_v38  ;;  %v875_v44 = vsel %vm873_vm7, %v3413_v39, %v3403_v37  ;;  %v849_v45 = vsel %vm848_vm8, %v3407_v31, %v3412_v40  ;;  %v850_v46 = vsel %vm848_vm8, %v3408_v13, %v3413_v39  ;;  %v3553_v13 = vld [vmem:[%s4868_s4 + $0xb0] ss:$8 sps:$4 sm:$0xff]   ;;  %v3558_v31 = vld [vmem:[%s4868_s4 + $0xc4] ss:$8 sps:$4 sm:$0xff]   ;;  %v3562_v39 = vld [vmem:[%s4868_s4 + $0xe0] ss:$8 sps:$4 sm:$0xff]  }
 0x1fe   : > { %v3416_v47 = vpop.permute.xlu0 %3415  ;;  %v3426_v48 = vpop.permute.xlu1 %3425  ;;  %v879_v49 = vmax.f32 %v4085_v2, %v874_v43  ;;  %v881_v50 = vmax.f32 %v819_v20, %v875_v44  ;;  %v878_v51 = vmax.f32 %v4082_v61, %v849_v45  ;;  %v880_v52 = vmax.f32 %v818_v16, %v850_v46  ;;  %v3531_v16 = vld [vmem:[%s4868_s4 + $0x34] ss:$8 sps:$4 sm:$0xff]   ;;  %v3559_v37 = vld [vmem:[%s4868_s4 + $0xd0] ss:$8 sps:$4 sm:$0xff]   ;;  %v3564_v38 = vld [vmem:[%s4868_s4 + $0xe4] ss:$8 sps:$4 sm:$0xff]  }
 0x1ff   : > { %v3418_v53 = vunpack.i.h.bf16 %v3416_v47  ;;  %v3417_v54 = vunpack.i.l.bf16 %v3416_v47  ;;  %v3428_v55 = vunpack.i.h.bf16 %v3426_v48  ;;  %v3427_v56 = vunpack.i.l.bf16 %v3426_v48  ;;  %v3537_v20 = vld [vmem:[%s4868_s4 + $0x54] ss:$8 sps:$4 sm:$0xff]   ;;  %v3565_v40 = vld [vmem:[%s4868_s4 + $0xf0] ss:$8 sps:$4 sm:$0xff]  }
 0x200   : > { %v887_v57 = vpack.c.bf16 %v881_v50, %v879_v49  ;;  %v886_v58 = vpack.c.bf16 %v880_v52, %v878_v51 }
 0x201   : > { %v876_v59 = vsel %vm873_vm7, %v3422_v42, %v3417_v54  ;;  %v877_v60 = vsel %vm873_vm7, %v3423_v41, %v3418_v53  ;;  %v851_v62 = vsel %vm848_vm8, %v3427_v56, %v3422_v42  ;;  %v852_v63 = vsel %vm848_vm8, %v3428_v55, %v3423_v41  ;;  %v3567_v41 = vld [vmem:[%s4868_s4 + $0xf4] ss:$8 sps:$4 sm:$0xff]  }
 0x202   : > { %898 = vmatprep.subr.bf16.mxu1 %v887_v57  ;;  %v883_v0 = vmax.f32 %v821_v6, %v876_v59  ;;  %v885_v1 = vmax.f32 %v823_v7, %v877_v60  ;;  %v882_v2 = vmax.f32 %v820_v25, %v851_v62  ;;  %v884_v61 = vmax.f32 %v4091_v21, %v852_v63  ;;  %v3535_v21 = vld [vmem:[%s4868_s4 + $0x50] ss:$8 sps:$4 sm:$0xff]   ;;  %v3543_v7 = vld [vmem:[%s4868_s4 + $0x74] ss:$8 sps:$4 sm:$0xff]   ;;  %v3546_v25 = vld [vmem:[%s4868_s4 + $0x84] ss:$8 sps:$4 sm:$0xff]  }
 0x203   : > { %899 = vmatpush1.bf16.msra.mxu1 %v886_v58  ;;  %v3544_v6 = vld [vmem:[%s4868_s4 + $0x80] ss:$8 sps:$4 sm:$0xff]  }
 0x204   : > { %v889_v3 = vpack.c.bf16 %v885_v1, %v883_v0  ;;  %v888_v4 = vpack.c.bf16 %v884_v61, %v882_v2  ;;  %v3570_v61 = vld [vmem:[%s4868_s4 + $0x104] ss:$8 sps:$4 sm:$0xff]  }
 0x206   : > { %900 = vmatprep.subr.bf16.mxu1 %v889_v3 }
 0x207   : > { %901 = vmatpush1.bf16.msra.mxu1 %v888_v4 }
 0x208   : > { %1729 = vmatprep.subr.bf16.mxu1 %v3522_v10 }
 0x20a   : > { %2984 = vmatmul.mubr.msk.bf16.vlgmr.msra.gmra.mrb[0].mxu1 %vm562_vm4, %v3519_v5 }
 0x20b   : > { %1730 = vmatpush1.bf16.msra.mxu1 %v3520_v9 }
 0x20c   : > { %1731 = vmatprep.subr.bf16.mxu1 %v3525_v11 }
 0x20f   : > { %1732 = vmatpush1.bf16.msra.mxu1 %v3523_v12 }
 0x210   : > { %1733 = vmatprep.subr.bf16.mxu1 %v3528_v14 }
 0x213   : > { %1734 = vmatpush1.bf16.msra.mxu1 %v3526_v15 }
 0x214   : > { %1735 = vmatprep.subr.bf16.mxu1 %v3531_v16 }
 0x217   : > { %1736 = vmatpush1.bf16.msra.mxu1 %v3529_v17 }
 0x218   : > { %1737 = vmatprep.subr.bf16.mxu1 %v3534_v18 }
 0x21b   : > { %1738 = vmatpush1.bf16.msra.mxu1 %v3532_v19 }
 0x21c   : > { %1739 = vmatprep.subr.bf16.mxu1 %v3537_v20 }
 0x21f   : > { %1740 = vmatpush1.bf16.msra.mxu1 %v3535_v21 }
 0x220   : > { %1741 = vmatprep.subr.bf16.mxu1 %v3540_v22 }
 0x223   : > { %1742 = vmatpush1.bf16.msra.mxu1 %v3538_v23 }
 0x224   : > { %1743 = vmatprep.subr.bf16.mxu1 %v3543_v7 }
 0x227   : > { %1744 = vmatpush1.bf16.msra.mxu1 %v3541_v24 }
 0x228   : > { %1745 = vmatprep.subr.bf16.mxu1 %v3546_v25 }
 0x22b   : > { %1746 = vmatpush1.bf16.msra.mxu1 %v3544_v6 }
 0x22c   : > { %1747 = vmatprep.subr.bf16.mxu1 %v3549_v26 }
 0x22f   : > { %1748 = vmatpush1.bf16.msra.mxu1 %v3547_v27 }
 0x230   : > { %1749 = vmatprep.subr.bf16.mxu1 %v3552_v29 }
 0x233   : > { %1750 = vmatpush1.bf16.msra.mxu1 %v3550_v30 }
 0x234   : > { %1751 = vmatprep.subr.bf16.mxu1 %v3555_v8 }
 0x237   : > { %1752 = vmatpush1.bf16.msra.mxu1 %v3553_v13 }
 0x238   : > { %1753 = vmatprep.subr.bf16.mxu1 %v3558_v31 }
 0x23b   : > { %1754 = vmatpush1.bf16.msra.mxu1 %v3556_v32 }
 0x23c   : > { %1755 = vmatprep.subr.bf16.mxu1 %v3561_v35 }
 0x23f   : > { %1756 = vmatpush1.bf16.msra.mxu1 %v3559_v37 }
 0x240   : > { %1757 = vmatprep.subr.bf16.mxu1 %v3564_v38  ;;  %v3568_v38 = vld [vmem:[%s4868_s4 + $0x100] ss:$8 sps:$4 sm:$0xff]  }
 0x243   : > { %1758 = vmatpush1.bf16.msra.mxu1 %v3562_v39 }
 0x244   : > { %1759 = vmatprep.subr.bf16.mxu1 %v3567_v41 }
 0x247   : > { %1760 = vmatpush1.bf16.msra.mxu1 %v3565_v40  ;;  %v3573_v40 = vld [vmem:[%s4868_s4 + $0x114] ss:$8 sps:$4 sm:$0xff]  }
 0x248   : > { %1772 = vmatprep.subr.bf16.mxu1 %v3570_v61 }
 0x2dd   : > { %v4215_v42 = vpop.f32.mrb[0].mxu1 }
 0x2de   : > { %v945_v43 = vrot.slane %v4215_v42, 1  ;;  %v957_v44 = vrot.slane %v4215_v42, 2  ;;  %v969_v45 = vrot.slane %v4215_v42, 3  ;;  %v981_v46 = vrot.slane %v4215_v42, 4  ;;  %v934_v47 = vpop.f32.mrb[1].mxu1 }
 0x2df   : > { %v948_v48 = vrot.slane %v934_v47, 1  ;;  %v960_v49 = vrot.slane %v934_v47, 2  ;;  %v972_v50 = vrot.slane %v934_v47, 3  ;;  %v984_v51 = vrot.slane %v934_v47, 4  ;;  %v4221_v52 = vpop.f32.mrb[2].mxu1 }
 0x2e0   : > { %v946_v53 = vrot.slane %v4221_v52, 1  ;;  %v958_v54 = vrot.slane %v4221_v52, 2  ;;  %v970_v55 = vrot.slane %v4221_v52, 3  ;;  %v982_v56 = vrot.slane %v4221_v52, 4  ;;  %v938_v57 = vpop.f32.mrb[3].mxu1 }
 0x2e1   : > { %v949_v58 = vrot.slane %v938_v57, 1  ;;  %v961_v59 = vrot.slane %v938_v57, 2  ;;  %v973_v60 = vrot.slane %v938_v57, 3  ;;  %v985_v62 = vrot.slane %v938_v57, 4 }
 0x2e2   : > { %v947_v63 = vsel %vm476_vm0, %v945_v43, %v946_v53  ;;  %v955_v0 = vsel %vm476_vm0, %v946_v53, %v945_v43  ;;  %v959_v1 = vsel %vm487_vm2, %v957_v44, %v958_v54  ;;  %v967_v2 = vsel %vm487_vm2, %v958_v54, %v957_v44  ;;  %v3576_v53 = vld [vmem:[%s4868_s4 + $0x124] ss:$8 sps:$4 sm:$0xff]  }
 0x2e3   : > { %v3429_v3 = vpack.i.bf16 %v955_v0, %v947_v63  ;;  %v962_v4 = vsel %vm487_vm2, %v960_v49, %v961_v59  ;;  %v968_v5 = vsel %vm487_vm2, %v961_v59, %v960_v49  ;;  %v950_v9 = vsel %vm476_vm0, %v948_v48, %v949_v58  ;;  %v3571_v49 = vld [vmem:[%s4868_s4 + $0x110] ss:$8 sps:$4 sm:$0xff]  }
 0x2e4   : > { %v3434_v10 = vpack.i.bf16 %v962_v4, %v959_v1  ;;  %v3439_v11 = vpack.i.bf16 %v968_v5, %v967_v2  ;;  %v956_v12 = vsel %vm476_vm0, %v949_v58, %v948_v48  ;;  %v971_v14 = vsel %vm498_vm1, %v969_v45, %v970_v55  ;;  %v3574_v2 = vld [vmem:[%s4868_s4 + $0x120] ss:$8 sps:$4 sm:$0xff]  }
 0x2e5   : > { %3430 = vrot.lane.b32.xlu0 %v3429_v3, %s3812_s19  ;;  %v3444_v15 = vpack.i.bf16 %v956_v12, %v950_v9  ;;  %v979_v16 = vsel %vm498_vm1, %v970_v55, %v969_v45  ;;  %v974_v17 = vsel %vm498_vm1, %v972_v50, %v973_v60  ;;  %v980_v18 = vsel %vm498_vm1, %v973_v60, %v972_v50 }
 0x2e6   : > { %3435 = vrot.lane.b32.xlu1 %v3434_v10, %s3813_s22  ;;  %v3449_v19 = vpack.i.bf16 %v979_v16, %v971_v14  ;;  %v3454_v20 = vpack.i.bf16 %v980_v18, %v974_v17  ;;  %v983_v21 = vsel %vm509_vm3, %v981_v46, %v982_v56  ;;  %v991_v22 = vsel %vm509_vm3, %v982_v56, %v981_v46  ;;  %v3579_v10 = vld [vmem:[%s4868_s4 + $0x134] ss:$8 sps:$4 sm:$0xff]   ;;  %v3577_v16 = vld [vmem:[%s4868_s4 + $0x130] ss:$8 sps:$4 sm:$0xff]   ;;  %v3582_v18 = vld [vmem:[%s4868_s4 + $0x144] ss:$8 sps:$4 sm:$0xff]  }
 0x2e7   : > { %v3459_v23 = vpack.i.bf16 %v991_v22, %v983_v21  ;;  %v986_v7 = vsel %vm509_vm3, %v984_v51, %v985_v62  ;;  %v992_v24 = vsel %vm509_vm3, %v985_v62, %v984_v51  ;;  %v1175_v25 = vpack.c.bf16 %v4221_v52, %v4215_v42  ;;  %v3583_v21 = vld [vmem:[%s4868_s4 + $0x150] ss:$8 sps:$4 sm:$0xff]   ;;  %v3588_v22 = vld [vmem:[%s4868_s4 + $0x164] ss:$8 sps:$4 sm:$0xff]  }
 0x2e8   : > { %v3464_v6 = vpack.i.bf16 %v992_v24, %v986_v7  ;;  %v3591_v7 = vld [vmem:[%s4868_s4 + $0x174] ss:$8 sps:$4 sm:$0xff]   ;;  %v3589_v24 = vld [vmem:[%s4868_s4 + $0x170] ss:$8 sps:$4 sm:$0xff]   ;;  %vm2842_vm1 = vcmask 1041408   ;;  %vm2838_vm2 = vcmask 687104  }
 0x2e9   : > { %3440 = vrot.lane.b32.xlu0 %v3439_v11, %s3813_s22 }
 0x2ea   : > { %3445 = vrot.lane.b32.xlu1 %v3444_v15, %s3812_s19  ;;  %s460_s19 = scalar_lea.vmem [#allocation2], %s459_s18 }
 0x2eb   : > { %s2900_s22 = sshll.u32 %s460_s19, 4  ;;  %s4824_s22 = int_to_ptr.vmem [resolvable:$true] %s2900_s22 }
 0x2ed   : > { %3450 = vrot.lane.b32.xlu0 %v3449_v19, %s3814_s29  ;;  %v3580_v19 = vld [vmem:[%s4868_s4 + $0x140] ss:$8 sps:$4 sm:$0xff]  }
 0x2ee   : > { %3455 = vrot.lane.b32.xlu1 %v3454_v20, %s3814_s29  ;;  %v3585_v20 = vld [vmem:[%s4868_s4 + $0x154] ss:$8 sps:$4 sm:$0xff]   ;;  %s4894_s29 = smov 64  }
 0x2f1   : > { %3460 = vrot.lane.b32.xlu0 %v3459_v23, %s3806_s24  ;;  %v3586_v23 = vld [vmem:[%s4868_s4 + $0x160] ss:$8 sps:$4 sm:$0xff]  }
 0x2f2   : > { %3465 = vrot.lane.b32.xlu1 %v3464_v6, %s3806_s24  ;;  %v3592_v6 = vld [vmem:[%s4868_s4 + $0x180] ss:$8 sps:$4 sm:$0xff]  }
 0x357   : > { %v3431_v26 = vpop.permute.xlu0 %3430 }
 0x358   : > { %v3433_v27 = vunpack.i.h.bf16 %v3431_v26  ;;  %v3432_v29 = vunpack.i.l.bf16 %v3431_v26  ;;  %v3436_v30 = vpop.permute.xlu1 %3435  ;;  %v3597_v26 = vld [vmem:[%s4868_s4 + $0x194] ss:$8 sps:$4 sm:$0xff]  }
 0x359   : > { %v3438_v31 = vunpack.i.h.bf16 %v3436_v30  ;;  %v3437_v32 = vunpack.i.l.bf16 %v3436_v30  ;;  %v3598_v30 = vld [vmem:[%s4868_s4 + $0x1a0] ss:$8 sps:$4 sm:$0xff]  }
 0x35a   : > { %v1062_v8 = vsel %vm1003_vm9, %v934_v47, %v3432_v29  ;;  %v1063_v13 = vsel %vm1003_vm9, %v938_v57, %v3433_v27 }
 0x35b   : > { %v3441_v35 = vpop.permute.xlu0 %3440  ;;  %v1176_v37 = vpack.c.bf16 %v1063_v13, %v1062_v8  ;;  %v1021_v45 = vsel %vm1020_vm10, %v3437_v32, %v3438_v31  ;;  %v3603_v8 = vld [vmem:[%s4868_s4 + $0x1b4] ss:$8 sps:$4 sm:$0xff]   ;;  %v3601_v13 = vld [vmem:[%s4868_s4 + $0x1b0] ss:$8 sps:$4 sm:$0xff]   ;;  %v3606_v31 = vld [vmem:[%s4868_s4 + $0x1c4] ss:$8 sps:$4 sm:$0xff]  }
 0x35c   : > { %v3446_v39 = vpop.permute.xlu1 %3445  ;;  %v3443_v41 = vunpack.i.h.bf16 %v3441_v35  ;;  %v3442_v42 = vunpack.i.l.bf16 %v3441_v35  ;;  %v3609_v35 = vld [vmem:[%s4868_s4 + $0x1d4] ss:$8 sps:$4 sm:$0xff]  }
 0x35d   : > { %v3448_v43 = vunpack.i.h.bf16 %v3446_v39  ;;  %v3447_v44 = vunpack.i.l.bf16 %v3446_v39  ;;  %1761 = vmatprep.mubr.bf16.mxu1 %v1176_v37  ;;  %v3607_v37 = vld [vmem:[%s4868_s4 + $0x1d0] ss:$8 sps:$4 sm:$0xff]   ;;  %v3610_v39 = vld [vmem:[%s4868_s4 + $0x1e0] ss:$8 sps:$4 sm:$0xff]  }
 0x35e   : > { %1762 = vmatmul.mubr.bf16.vlgmr.msra.gmra.mrb[4].mxu1 %v1175_v25  ;;  %v1022_v56 = vsel %vm1020_vm10, %v3442_v42, %v3443_v41  ;;  %v3594_v25 = vld [vmem:[%s4868_s4 + $0x184] ss:$8 sps:$4 sm:$0xff]   ;;  %v3613_v41 = vld [vmem:[%s4868_s4 + $0x1f0] ss:$8 sps:$4 sm:$0xff]  }
 0x35f   : > { %v1005_v46 = vsel %vm1003_vm9, %v3433_v27, %v3448_v43  ;;  %v1004_v47 = vsel %vm1003_vm9, %v3432_v29, %v3447_v44  ;;  %1773 = vmatpush1.bf16.msra.mxu1 %v3568_v38  ;;  %v3451_v48 = vpop.permute.xlu0 %3450  ;;  %v3595_v27 = vld [vmem:[%s4868_s4 + $0x190] ss:$8 sps:$4 sm:$0xff]   ;;  %v3600_v29 = vld [vmem:[%s4868_s4 + $0x1a4] ss:$8 sps:$4 sm:$0xff]  }
 0x360   : > { %v3453_v50 = vunpack.i.h.bf16 %v3451_v48  ;;  %v3452_v51 = vunpack.i.l.bf16 %v3451_v48  ;;  %v4264_v52 = vpop.permute.xlu1 %3455  ;;  %1774 = vmatprep.subr.bf16.mxu1 %v3573_v40  ;;  %v4270_v54 = vsel %vm1020_vm10, %v1004_v47, %v3437_v32  ;;  %v4273_v55 = vsel %vm1020_vm10, %v1005_v46, %v3442_v42  ;;  %v3604_v32 = vld [vmem:[%s4868_s4 + $0x1c0] ss:$8 sps:$4 sm:$0xff]   ;;  %v3612_v38 = vld [vmem:[%s4868_s4 + $0x1e4] ss:$8 sps:$4 sm:$0xff]   ;;  %v3615_v40 = vld [vmem:[%s4868_s4 + $0x1f4] ss:$8 sps:$4 sm:$0xff]  }
 0x361   : > { %v3458_v57 = vunpack.i.h.bf16 %v4264_v52  ;;  %v3457_v58 = vunpack.i.l.bf16 %v4264_v52  ;;  %v1177_v59 = vpack.c.bf16 %v4273_v55, %v4270_v54  ;;  %v3618_v42 = vld [vmem:[%s4868_s4 + $0x204] ss:$8 sps:$4 sm:$0xff]   ;;  %v3621_v46 = vld [vmem:[%s4868_s4 + $0x214] ss:$8 sps:$4 sm:$0xff]   ;;  %v3619_v48 = vld [vmem:[%s4868_s4 + $0x210] ss:$8 sps:$4 sm:$0xff]  }
 0x362   : > { %v1066_v60 = vsel %vm1037_vm11, %v1021_v45, %v3452_v51  ;;  %v1067_v62 = vsel %vm1037_vm11, %v1022_v56, %v3453_v50  ;;  %v3616_v45 = vld [vmem:[%s4868_s4 + $0x200] ss:$8 sps:$4 sm:$0xff]   ;;  %v3625_v52 = vld [vmem:[%s4868_s4 + $0x230] ss:$8 sps:$4 sm:$0xff]   ;;  %v3633_v55 = vld [vmem:[%s4868_s4 + $0x254] ss:$8 sps:$4 sm:$0xff]  }
 0x363   : > { %v4285_v63 = vsel %vm1037_vm11, %v3453_v50, %v3458_v57  ;;  %v4290_v0 = vsel %vm1037_vm11, %v3452_v51, %v3457_v58  ;;  %1775 = vmatpush1.bf16.msra.mxu1 %v3571_v49  ;;  %v4292_v1 = vpop.permute.xlu0 %3460  ;;  %v1178_v61 = vpack.c.bf16 %v1067_v62, %v1066_v60  ;;  %v3624_v49 = vld [vmem:[%s4868_s4 + $0x224] ss:$8 sps:$4 sm:$0xff]   ;;  %v3622_v50 = vld [vmem:[%s4868_s4 + $0x220] ss:$8 sps:$4 sm:$0xff]   ;;  %v3627_v51 = vld [vmem:[%s4868_s4 + $0x234] ss:$8 sps:$4 sm:$0xff]  }
 0x364   : > { %v1179_v3 = vpack.c.bf16 %v4285_v63, %v4290_v0  ;;  %v3463_v4 = vunpack.i.h.bf16 %v4292_v1  ;;  %v3462_v5 = vunpack.i.l.bf16 %v4292_v1  ;;  %v3466_v9 = vpop.permute.xlu1 %3465  ;;  %1776 = vmatprep.subr.bf16.mxu1 %v3576_v53  ;;  %v3630_v53 = vld [vmem:[%s4868_s4 + $0x244] ss:$8 sps:$4 sm:$0xff]   ;;  %v3628_v54 = vld [vmem:[%s4868_s4 + $0x240] ss:$8 sps:$4 sm:$0xff]   ;;  %v3631_v56 = vld [vmem:[%s4868_s4 + $0x250] ss:$8 sps:$4 sm:$0xff]  }
 0x365   : > { %v3468_v11 = vunpack.i.h.bf16 %v3466_v9  ;;  %v3467_v12 = vunpack.i.l.bf16 %v3466_v9  ;;  %1804 = vmatprep.mubr.bf16.mxu1 %v1178_v61  ;;  %v3637_v60 = vld [vmem:[%s4868_s4 + $0x270] ss:$8 sps:$4 sm:$0xff]   ;;  %v3642_v62 = vld [vmem:[%s4868_s4 + $0x284] ss:$8 sps:$4 sm:$0xff]   ;;  %v3640_v1 = vld [vmem:[%s4868_s4 + $0x280] ss:$8 sps:$4 sm:$0xff]  }
 0x366   : > { %v1068_v43 = vsel %vm562_vm4, %v3457_v58, %v3462_v5  ;;  %v1069_v44 = vsel %vm562_vm4, %v3458_v57, %v3463_v4  ;;  %v3636_v57 = vld [vmem:[%s4868_s4 + $0x264] ss:$8 sps:$4 sm:$0xff]   ;;  %v3634_v58 = vld [vmem:[%s4868_s4 + $0x260] ss:$8 sps:$4 sm:$0xff]   ;;  %v3643_v61 = vld [vmem:[%s4868_s4 + $0x290] ss:$8 sps:$4 sm:$0xff]  }
 0x367   : > { %v4307_v14 = vsel %vm562_vm4, %v3463_v4, %v3468_v11  ;;  %v4312_v15 = vsel %vm562_vm4, %v3462_v5, %v3467_v12  ;;  %1777 = vmatpush1.bf16.msra.mxu1 %v3574_v2  ;;  %v1180_v47 = vpack.c.bf16 %v1069_v44, %v1068_v43  ;;  %v3645_v2 = vld [vmem:[%s4868_s4 + $0x294] ss:$8 sps:$4 sm:$0xff]   ;;  %v3648_v4 = vld [vmem:[%s4868_s4 + $0x2a4] ss:$8 sps:$4 sm:$0xff]   ;;  %v3646_v5 = vld [vmem:[%s4868_s4 + $0x2a0] ss:$8 sps:$4 sm:$0xff]  }
 0x368   : > { %v1181_v17 = vpack.c.bf16 %v4307_v14, %v4312_v15  ;;  %1778 = vmatprep.subr.bf16.mxu1 %v3579_v10  ;;  %v3651_v9 = vld [vmem:[%s4868_s4 + $0x2b4] ss:$8 sps:$4 sm:$0xff]   ;;  %v3649_v10 = vld [vmem:[%s4868_s4 + $0x2b0] ss:$8 sps:$4 sm:$0xff]   ;;  %v3654_v11 = vld [vmem:[%s4868_s4 + $0x2c4] ss:$8 sps:$4 sm:$0xff]  }
 0x369   : > { %v3652_v12 = vld [vmem:[%s4868_s4 + $0x2c0] ss:$8 sps:$4 sm:$0xff]   ;;  %v3675_v63 = vld [vmem:[%s4868_s4 + $0x334] ss:$8 sps:$4 sm:$0xff]  }
 0x36a   : > { %v1174_v0 = vld [vmem:[%s4868_s4 + $0x340] sm:$0xff] }
 0x36b   : > { %1779 = vmatpush1.bf16.msra.mxu1 %v3577_v16  ;;  %v3657_v16 = vld [vmem:[%s4868_s4 + $0x2d4] ss:$8 sps:$4 sm:$0xff]  }
 0x36c   : > { %1780 = vmatprep.subr.bf16.mxu1 %v3582_v18  ;;  %v3655_v18 = vld [vmem:[%s4868_s4 + $0x2d0] ss:$8 sps:$4 sm:$0xff]  }
 0x36f   : > { %1781 = vmatpush1.bf16.msra.mxu1 %v3580_v19  ;;  %v3660_v19 = vld [vmem:[%s4868_s4 + $0x2e4] ss:$8 sps:$4 sm:$0xff]  }
 0x370   : > { %1782 = vmatprep.subr.bf16.mxu1 %v3585_v20  ;;  %v3658_v20 = vld [vmem:[%s4868_s4 + $0x2e0] ss:$8 sps:$4 sm:$0xff]  }
 0x373   : > { %1783 = vmatpush1.bf16.msra.mxu1 %v3583_v21  ;;  %v3663_v21 = vld [vmem:[%s4868_s4 + $0x2f4] ss:$8 sps:$4 sm:$0xff]  }
 0x374   : > { %1784 = vmatprep.subr.bf16.mxu1 %v3588_v22  ;;  %v3661_v22 = vld [vmem:[%s4868_s4 + $0x2f0] ss:$8 sps:$4 sm:$0xff]  }
 0x377   : > { %1785 = vmatpush1.bf16.msra.mxu1 %v3586_v23  ;;  %v3666_v23 = vld [vmem:[%s4868_s4 + $0x304] ss:$8 sps:$4 sm:$0xff]  }
 0x378   : > { %1786 = vmatprep.subr.bf16.mxu1 %v3591_v7  ;;  %v3664_v7 = vld [vmem:[%s4868_s4 + $0x300] ss:$8 sps:$4 sm:$0xff]  }
 0x37b   : > { %1787 = vmatpush1.bf16.msra.mxu1 %v3589_v24  ;;  %v3669_v24 = vld [vmem:[%s4868_s4 + $0x314] ss:$8 sps:$4 sm:$0xff]  }
 0x37c   : > { %1788 = vmatprep.subr.bf16.mxu1 %v3594_v25  ;;  %v3667_v25 = vld [vmem:[%s4868_s4 + $0x310] ss:$8 sps:$4 sm:$0xff]  }
 0x37f   : > { %1789 = vmatpush1.bf16.msra.mxu1 %v3592_v6  ;;  %v3672_v6 = vld [vmem:[%s4868_s4 + $0x324] ss:$8 sps:$4 sm:$0xff]  }
 0x380   : > { %1790 = vmatprep.subr.bf16.mxu1 %v3597_v26  ;;  %v3670_v26 = vld [vmem:[%s4868_s4 + $0x320] ss:$8 sps:$4 sm:$0xff]  }
 0x383   : > { %1791 = vmatpush1.bf16.msra.mxu1 %v3595_v27  ;;  %v3089_v27 = vcombine.low %v1174_v0, %v1174_v0 }
 0x384   : > { %1792 = vmatprep.subr.bf16.mxu1 %v3600_v29 }
 0x385   : > { %v1724_v29 = vsel %vm509_vm3, %v3089_v27, 0  ;;  %v3691_v27 = vld [vmem:[%s4871_s7 + $0x30] sm:$0xff]  }
 0x387   : > { %1793 = vmatpush1.bf16.msra.mxu1 %v3598_v30  ;;  %v1182_v30 = vld [vmem:[%s4869_s5] sm:$0x3] }
 0x388   : > { %1794 = vmatprep.subr.bf16.mxu1 %v3603_v8  ;;  %v1187_v8 = vrot.slane %v1182_v30, %v605_v34 }
 0x38b   : > { %1795 = vmatpush1.bf16.msra.mxu1 %v3601_v13  ;;  %v1191_v13 = vrot.slane %v1182_v30, %v609_v36  ;;  %v3693_v30 = vld [vmem:[%s4871_s7 + $0x38] sm:$0xff]  }
 0x38c   : > { %1796 = vmatprep.subr.bf16.mxu1 %v3606_v31 }
 0x38f   : > { %1797 = vmatpush1.bf16.msra.mxu1 %v3604_v32 }
 0x390   : > { %1798 = vmatprep.subr.bf16.mxu1 %v3609_v35 }
 0x393   : > { %1799 = vmatpush1.bf16.msra.mxu1 %v3607_v37 }
 0x394   : > { %1800 = vmatprep.subr.bf16.mxu1 %v3612_v38 }
 0x397   : > { %1801 = vmatpush1.bf16.msra.mxu1 %v3610_v39 }
 0x398   : > { %1802 = vmatprep.subr.bf16.mxu1 %v3615_v40 }
 0x39b   : > { %1803 = vmatpush1.bf16.msra.mxu1 %v3613_v41 }
 0x39c   : > { %1815 = vmatprep.subr.bf16.mxu1 %v3618_v42 }
 0x39e   : > { %1805 = vmatmul.mubr.bf16.vlgmr.msra.gmra.mrb[4].mxu1 %v1177_v59  ;;  %v3639_v59 = vld [vmem:[%s4868_s4 + $0x274] ss:$8 sps:$4 sm:$0xff]  }
 0x39f   : > { %1816 = vmatpush1.bf16.msra.mxu1 %v3616_v45  ;;  %1847 = vmatprep.mubr.bf16.mxu1 %v1180_v47 }
 0x3a0   : > { %1817 = vmatprep.subr.bf16.mxu1 %v3621_v46 }
 0x3a3   : > { %1818 = vmatpush1.bf16.msra.mxu1 %v3619_v48 }
 0x3a4   : > { %1819 = vmatprep.subr.bf16.mxu1 %v3624_v49 }
 0x3a7   : > { %1820 = vmatpush1.bf16.msra.mxu1 %v3622_v50 }
 0x3a8   : > { %1821 = vmatprep.subr.bf16.mxu1 %v3627_v51 }
 0x3ab   : > { %1822 = vmatpush1.bf16.msra.mxu1 %v3625_v52 }
 0x3ac   : > { %1823 = vmatprep.subr.bf16.mxu1 %v3630_v53 }
 0x3af   : > { %1824 = vmatpush1.bf16.msra.mxu1 %v3628_v54 }
 0x3b0   : > { %1825 = vmatprep.subr.bf16.mxu1 %v3633_v55 }
 0x3b3   : > { %1826 = vmatpush1.bf16.msra.mxu1 %v3631_v56 }
 0x3b4   : > { %1827 = vmatprep.subr.bf16.mxu1 %v3636_v57 }
 0x3b7   : > { %1828 = vmatpush1.bf16.msra.mxu1 %v3634_v58 }
 0x3b8   : > { %1829 = vmatprep.subr.bf16.mxu1 %v3639_v59 }
 0x3bb   : > { %1830 = vmatpush1.bf16.msra.mxu1 %v3637_v60 }
 0x3bc   : > { %1831 = vmatprep.subr.bf16.mxu1 %v3642_v62 }
 0x3bf   : > { %1832 = vmatpush1.bf16.msra.mxu1 %v3640_v1 }
 0x3c0   : > { %1833 = vmatprep.subr.bf16.mxu1 %v3645_v2 }
 0x3c3   : > { %1834 = vmatpush1.bf16.msra.mxu1 %v3643_v61 }
 0x3c4   : > { %1835 = vmatprep.subr.bf16.mxu1 %v3648_v4 }
 0x3c7   : > { %1836 = vmatpush1.bf16.msra.mxu1 %v3646_v5 }
 0x3c8   : > { %1837 = vmatprep.subr.bf16.mxu1 %v3651_v9 }
 0x3cb   : > { %1838 = vmatpush1.bf16.msra.mxu1 %v3649_v10 }
 0x3cc   : > { %1839 = vmatprep.subr.bf16.mxu1 %v3654_v11 }
 0x3cf   : > { %1840 = vmatpush1.bf16.msra.mxu1 %v3652_v12 }
 0x3d0   : > { %1841 = vmatprep.subr.bf16.mxu1 %v3657_v16 }
 0x3d3   : > { %1842 = vmatpush1.bf16.msra.mxu1 %v3655_v18 }
 0x3d4   : > { %1843 = vmatprep.subr.bf16.mxu1 %v3660_v19  ;;  %v1905_v19 = vld [vmem:[%s4870_s6] sm:$0xf] }
 0x3d7   : > { %1844 = vmatpush1.bf16.msra.mxu1 %v3658_v20  ;;  %v3678_v20 = vld [vmem:[%s4871_s7 + $0x40] sm:$0xff]  }
 0x3d8   : > { %1845 = vmatprep.subr.bf16.mxu1 %v3663_v21  ;;  %v3679_v21 = vld [vmem:[%s4871_s7] sm:$0xff]  }
 0x3db   : > { %1846 = vmatpush1.bf16.msra.mxu1 %v3661_v22  ;;  %v3680_v22 = vld [vmem:[%s4871_s7 + $0x48] sm:$0xff]  }
 0x3dc   : > { %1858 = vmatprep.subr.bf16.mxu1 %v3666_v23  ;;  %v3681_v23 = vld [vmem:[%s4871_s7 + $0x8] sm:$0xff]  }
 0x3de   : > { %1848 = vmatmul.mubr.bf16.vlgmr.msra.gmra.mrb[4].mxu1 %v1179_v3  ;;  %v3090_v3 = vcombine.high %v1174_v0, %v1174_v0  ;;  %v3688_v0 = vld [vmem:[%s4871_s7 + $0x68] sm:$0xff]  }
 0x3df   : > { %1859 = vmatpush1.bf16.msra.mxu1 %v3664_v7  ;;  %1890 = vmatprep.mubr.bf16.mxu1 %v3811_v28  ;;  %v3673_v28 = vld [vmem:[%s4868_s4 + $0x330] ss:$8 sps:$4 sm:$0xff]  }
 0x3e0   : > { %1860 = vmatprep.subr.bf16.mxu1 %v3669_v24  ;;  %v3682_v7 = vld [vmem:[%s4871_s7 + $0x50] sm:$0xff]  }
 0x3e1   : > { %v3683_v24 = vld [vmem:[%s4871_s7 + $0x10] sm:$0xff]  }
 0x3e3   : > { %1861 = vmatpush1.bf16.msra.mxu1 %v3667_v25  ;;  %v3684_v25 = vld [vmem:[%s4871_s7 + $0x58] sm:$0xff]  }
 0x3e4   : > { %1862 = vmatprep.subr.bf16.mxu1 %v3672_v6  ;;  %v3685_v6 = vld [vmem:[%s4871_s7 + $0x18] sm:$0xff]  }
 0x3e7   : > { %1863 = vmatpush1.bf16.msra.mxu1 %v3670_v26  ;;  %v3686_v26 = vld [vmem:[%s4871_s7 + $0x60] sm:$0xff]  }
 0x3e8   : > { %1864 = vmatprep.subr.bf16.mxu1 %v3675_v63  ;;  %v3687_v63 = vld [vmem:[%s4871_s7 + $0x20] sm:$0xff]  }
 0x3eb   : > { %1865 = vmatpush1.bf16.msra.mxu1 %v3673_v28  ;;  %v3689_v28 = vld [vmem:[%s4871_s7 + $0x28] sm:$0xff]  }
 0x3ec   : > { %3091 = vmatprep.subr.msk.bf16.mxu1 %vm509_vm3, %v3090_v3  ;;  %v3690_v3 = vld [vmem:[%s4871_s7 + $0x70] sm:$0xff]  }
 0x3ef   : > { %1867 = vmatpush1.bf16.msra.mxu1 %v1724_v29  ;;  %v3692_v29 = vld [vmem:[%s4871_s7 + $0x78] sm:$0xff]  }
 0x3f2   : > { %3092 = vmatmul.mubr.msk.bf16.vlgmr.msra.gmra.mrb[4].mxu1 %vm1719_vm12, %v1181_v17 }
 0x4c5   : > { %v1892_v31 = vpop.f32.mrb[4].mxu1 }
 0x4c6   : > { %v3302_v32 = vadd.f32 %v1892_v31, %v1187_v8  ;;  %v1894_v35 = vpop.f32.mrb[5].mxu1 }
 0x4c7   : > { %v3303_v37 = vadd.f32 %v1894_v35, %v1191_v13  ;;  %v1896_v38 = vpop.f32.mrb[6].mxu1 }
 0x4c8   : > { %v1901_v39 = vmax.f32 %v3302_v32, 0.0  ;;  %v3304_v40 = vadd.f32 %v1896_v38, %v1187_v8  ;;  %v1898_v41 = vpop.f32.mrb[7].mxu1  ;;  %v3694_v8 = vld [vmem:[%s4871_s7 + $0xc0] sm:$0xff]  }
 0x4c9   : > { %v1902_v14 = vmax.f32 %v3303_v37, 0.0  ;;  %v3305_v15 = vadd.f32 %v1898_v41, %v1191_v13 }
 0x4ca   : > { %v1903_v17 = vmax.f32 %v3304_v40, 0.0  ;;  %v1910_v43 = vrot.slane %v1901_v39, 1 }
 0x4cb   : > { %v1904_v42 = vmax.f32 %v3305_v15, 0.0  ;;  %v1913_v45 = vrot.slane %v1902_v14, 1 }
 0x4cc   : > { %v1911_v44 = vrot.slane %v1903_v17, 1 }
 0x4cd   : > { %v1914_v46 = vrot.slane %v1904_v42, 1 }
 0x4ce   : > { %v1912_v34 = vsel %vm476_vm0, %v1910_v43, %v1911_v44  ;;  %v1922_v33 = vsel %vm476_vm0, %v1911_v44, %v1910_v43  ;;  %v3695_v44 = vld [vmem:[%s4871_s7 + $0x80] sm:$0xff]  }
 0x4cf   : > { %v1926_v36 = vmax.f32 %v1903_v17, %v1922_v33  ;;  %v1923_v47 = vsel %vm476_vm0, %v1914_v46, %v1913_v45  ;;  %v1924_v48 = vmax.f32 %v1901_v39, %v1912_v34  ;;  %v1915_v49 = vsel %vm476_vm0, %v1913_v45, %v1914_v46  ;;  %v3696_v34 = vld [vmem:[%s4871_s7 + $0xc8] sm:$0xff]  }
 0x4d0   : > { %v1927_v50 = vmax.f32 %v1904_v42, %v1923_v47  ;;  %v1925_v51 = vmax.f32 %v1902_v14, %v1915_v49  ;;  %vm2635_vm0 = vcmask 64512  }
 0x4d1   : > { %v3469_v52 = vpack.i.bf16 %v1926_v36, %v1924_v48 }
 0x4d2   : > { %v3474_v53 = vpack.i.bf16 %v1927_v50, %v1925_v51 }
 0x4d3   : > { %3470 = vrot.lane.b32.xlu1 %v3469_v52, %s3815_s20 }
 0x4d4   : > { %3475 = vrot.lane.b32.xlu0 %v3474_v53, %s3809_s15  ;;  %v3699_v53 = vld [vmem:[%s4871_s7 + $0x90] sm:$0xff]  }
 0x4d8   : > { %3480 = vrot.lane.b32.xlu0 %v3469_v52, %s3809_s15  ;;  %s3162_s15 = sshll.u32 %s3915_s17, 4  ;;  %s3742_s17 = scalar_lea.vmem %s4824_s22, 16 }
 0x4d9   : > { %s4822_s21 = scalar_lea.hbm %s4878_s14, %s3162_s15  ;;  %p3743_p11 = scmp.ne.s32.totalorder %s4824_s22, %s3742_s17 }
 0x4db   : > { %p3744_p12 = pnand %p3743_p11, %p3932_p5 }
 0x4dd   : > { %p3745_p13 = pneg %p3744_p12 }
 0x545   : > { %v3471_v54 = vpop.permute.xlu1 %3470 }
 0x546   : > { %v3473_v55 = vunpack.i.h.bf16 %v3471_v54  ;;  %v3472_v56 = vunpack.i.l.bf16 %v3471_v54  ;;  %v3476_v57 = vpop.permute.xlu0 %3475  ;;  %v3700_v54 = vld [vmem:[%s4871_s7 + $0xd8] sm:$0xff]  }
 0x547   : > { %v3478_v58 = vunpack.i.h.bf16 %v3476_v57  ;;  %v3477_v59 = vunpack.i.l.bf16 %v3476_v57  ;;  %v3703_v57 = vld [vmem:[%s4871_s7 + $0xa0] sm:$0xff]  }
 0x549   : > { %v1953_v60 = vsel %vm1952_vm13, %v3477_v59, %v3472_v56  ;;  %v1954_v62 = vsel %vm1952_vm13, %v3478_v58, %v3473_v55  ;;  %v3701_v55 = vld [vmem:[%s4871_s7 + $0x98] sm:$0xff]   ;;  %v3702_v56 = vld [vmem:[%s4871_s7 + $0xe0] sm:$0xff]  }
 0x54a   : > { %v3481_v1 = vpop.permute.xlu0 %3480  ;;  %v1956_v2 = vmax.f32 %v1925_v51, %v1953_v60  ;;  %v1958_v61 = vmax.f32 %v1927_v50, %v1954_v62  ;;  %v3698_v50 = vld [vmem:[%s4871_s7 + $0xd0] sm:$0xff]  }
 0x54b   : > { %v3483_v4 = vunpack.i.h.bf16 %v3481_v1  ;;  %v3482_v5 = vunpack.i.l.bf16 %v3481_v1  ;;  %v3706_v60 = vld [vmem:[%s4871_s7 + $0xf0] sm:$0xff]  }
 0x54c   : > { %v1960_v9 = vpack.c.bf16 %v1958_v61, %v1956_v2  ;;  %v3707_v1 = vld [vmem:[%s4871_s7 + $0xb0] sm:$0xff]   ;;  %v3708_v2 = vld [vmem:[%s4871_s7 + $0xf8] sm:$0xff]  }
 0x54d   : > { %v1941_v10 = vsel %vm848_vm8, %v3483_v4, %v3478_v58  ;;  %v1940_v11 = vsel %vm848_vm8, %v3482_v5, %v3477_v59  ;;  %v3704_v58 = vld [vmem:[%s4871_s7 + $0xe8] sm:$0xff]   ;;  %v3709_v4 = vld [vmem:[%s4871_s7 + $0xb8] sm:$0xff]   ;;  %v3710_v5 = vld [vmem:[%s4871_s7 + $0x140] sm:$0xff]  }
 0x54e   : > { %v1957_v12 = vmax.f32 %v1926_v36, %v1941_v10  ;;  %v1955_v16 = vmax.f32 %v1924_v48, %v1940_v11  ;;  %1965 = vmatprep.subr.bf16.mxu0 %v1960_v9  ;;  %v3697_v48 = vld [vmem:[%s4871_s7 + $0x88] sm:$0xff]   ;;  %v3711_v11 = vld [vmem:[%s4871_s7 + $0x100] sm:$0xff]  }
 0x54f   : > { %v3705_v59 = vld [vmem:[%s4871_s7 + $0xa8] sm:$0xff]  }
 0x550   : > { %v1959_v18 = vpack.c.bf16 %v1957_v12, %v1955_v16  ;;  %v3712_v16 = vld [vmem:[%s4871_s7 + $0x148] sm:$0xff]  }
 0x552   : > { %1966 = vmatpush1.bf16.msra.mxu0 %v1959_v18 }
 0x553   : > { %3165 = vmatprep.subr.bf16.mxu0 %v3678_v20  ;;  %v3714_v20 = vld [vmem:[%s4871_s7 + $0x150] sm:$0xff]  }
 0x555   : > { %3093 = vmatmul.mubr.msk.bf16.vlgmr.msra.gmra.mrb[8].mxu0 %vm1961_vm14, %v1905_v19  ;;  %v3713_v19 = vld [vmem:[%s4871_s7 + $0x108] sm:$0xff]  }
 0x556   : > { %3166 = vmatpush3.bf16.msra.mxu0 %v3679_v21  ;;  %v3715_v21 = vld [vmem:[%s4871_s7 + $0x110] sm:$0xff]  }
 0x557   : > { %3167 = vmatprep.subr.bf16.mxu0 %v3680_v22  ;;  %v3716_v22 = vld [vmem:[%s4871_s7 + $0x158] sm:$0xff]  }
 0x55a   : > { %3168 = vmatpush3.bf16.msra.mxu0 %v3681_v23  ;;  %v3717_v23 = vld [vmem:[%s4871_s7 + $0x118] sm:$0xff]  }
 0x55b   : > { %3169 = vmatprep.subr.bf16.mxu0 %v3682_v7  ;;  %v3718_v7 = vld [vmem:[%s4871_s7 + $0x160] sm:$0xff]  }
 0x55e   : > { %3170 = vmatpush3.bf16.msra.mxu0 %v3683_v24  ;;  %v3719_v24 = vld [vmem:[%s4871_s7 + $0x120] sm:$0xff]  }
 0x55f   : > { %3171 = vmatprep.subr.bf16.mxu0 %v3684_v25  ;;  %v3720_v25 = vld [vmem:[%s4871_s7 + $0x168] sm:$0xff]  }
 0x562   : > { %3172 = vmatpush3.bf16.msra.mxu0 %v3685_v6  ;;  %v3721_v6 = vld [vmem:[%s4871_s7 + $0x128] sm:$0xff]  }
 0x563   : > { %3173 = vmatprep.subr.bf16.mxu0 %v3686_v26  ;;  %v3722_v26 = vld [vmem:[%s4871_s7 + $0x170] sm:$0xff]  }
 0x566   : > { %3174 = vmatpush3.bf16.msra.mxu0 %v3687_v63  ;;  %v3723_v63 = vld [vmem:[%s4871_s7 + $0x130] sm:$0xff]  }
 0x567   : > { %3175 = vmatprep.subr.bf16.mxu0 %v3688_v0  ;;  %v3724_v0 = vld [vmem:[%s4871_s7 + $0x178] sm:$0xff]  }
 0x56a   : > { %3176 = vmatpush3.bf16.msra.mxu0 %v3689_v28 }
 0x56b   : > { %3177 = vmatprep.subr.bf16.mxu0 %v3690_v3  ;;  %v3725_v3 = vld [vmem:[%s4871_s7 + $0x138] sm:$0xff]  }
 0x56e   : > { %3178 = vmatpush3.bf16.msra.mxu0 %v3691_v27 }
 0x56f   : > { %3179 = vmatprep.subr.bf16.mxu0 %v3692_v29  ;;  %v3726_v29 = vld [vmem:[%s4871_s7 + $0x180] sm:$0xff]  }
 0x572   : > { %3180 = vmatpush3.bf16.msra.mxu0 %v3693_v30 }
 0x573   : > { %3187 = vmatprep.subr.bf16.mxu0 %v3694_v8  ;;  %v3816_v8 = vmov 0.0  }
 0x628   : > { %v4605_v13 = vpop.f32.mrb[8].mxu0 }
 0x629   : > { %v4607_v31 = vpop.f32.mrb[9].mxu0  ;;  %v2008_v32 = vrot.slane %v4605_v13, 1  ;;  %v2014_v35 = vrot.slane %v4605_v13, 2  ;;  %v2020_v14 = vrot.slane %v4605_v13, 3  ;;  %v2162_v46 = vpack.c.bf16 %v4605_v13, %v4605_v13 }
 0x62a   : > { %v2015_v37 = vrot.slane %v4607_v31, 2  ;;  %v2003_v38 = vpop.f32.mrb[10].mxu0  ;;  %v2009_v41 = vrot.slane %v4607_v31, 1  ;;  %v2021_v15 = vrot.slane %v4607_v31, 3  ;;  %v2026_v10 = vrot.slane %v4605_v13, 4  ;;  %v3727_v13 = vld [vmem:[%s4871_s7 + $0x188] sm:$0xff]  }
 0x62b   : > { %2034 = vrot.lane.b32.xlu1 %v2008_v32, %s3806_s24  ;;  %v2004_v39 = vpop.f32.mrb[11].mxu0  ;;  %v2027_v32 = vrot.slane %v4607_v31, 4 }
 0x62c   : > { %v3484_v40 = vpack.i.bf16 %v2015_v37, %v2014_v35  ;;  %v2167_v18 = vpack.c.bf16 %v2026_v10, %v2026_v10 }
 0x62d   : > { %v2168_v35 = vpack.c.bf16 %v2027_v32, %v2027_v32 }
 0x62e   : > { %3485 = vrot.lane.b32.xlu0 %v3484_v40, %s4894_s29 }
 0x62f   : > { %2036 = vrot.lane.b32.xlu1 %v2009_v41, %s3806_s24  ;;  %s3818_s24 = smov [#allocation2]  }
 0x630   : > { %s3746_s28 = sshll.u32 %s3818_s24, 4  ;;  %s3747_s28 = int_to_ptr.vmem [resolvable:$false] %s3746_s28 }
 0x631   : > { %s3748_s26 = scalar_lea.vmem %s3747_s28, 32  ;;  %p3749_p0 = scmp.lt.s32.totalorder %s4824_s22, %s3747_s28 }
 0x632   : > { %2052 = vrot.lane.b32.xlu0 %v2020_v14, %s4895_s25  ;;  %p3750_p1 = scmp.lt.s32.totalorder %s3748_s26, %s3742_s17 }
 0x633   : > { %2054 = vrot.lane.b32.xlu1 %v2021_v15, %s4895_s25 }
 0x634   : > { %p3751_p2 = por %p3750_p1, %p3749_p0 }
 0x636   : > { %p3752_p3 = pnand %p3751_p2, %p3745_p13 }
 0x69d   : > { %v2035_v17 = vpop.permute.xlu1 %2034 }
 0x69e   : > { %v2059_v42 = vsel %vm562_vm4, %v4607_v31, %v2035_v17 }
 0x69f   : > { %v2163_v43 = vpack.c.bf16 %v2059_v42, %v2059_v42 }
 0x6a0   : > { %v3486_v45 = vpop.permute.xlu0 %3485 }
 0x6a1   : > { %2504 = vmatprep.mubr.bf16.mxu0 %v2163_v43  ;;  %v3488_v33 = vunpack.i.h.bf16 %v3486_v45  ;;  %v3487_v36 = vunpack.i.l.bf16 %v3486_v45  ;;  %v2037_v62 = vpop.permute.xlu1 %2036 }
 0x6a2   : > { %2505 = vmatmul.mubr.bf16.vlgmr.msra.gmra.mrb[12].mxu0 %v2162_v46  ;;  %v2038_v61 = vsel %vm562_vm4, %v2035_v17, %v2037_v62  ;;  %v3734_v62 = vld [vmem:[%s4874_s10 + $0x30] sm:$0xff]  }
 0x6a3   : > { %3188 = vmatpush3.bf16.msra.mxu0 %v3695_v44  ;;  %v2047_v47 = vsel %vm567_vm5, %v3487_v36, %v3488_v33  ;;  %v2060_v9 = vsel %vm567_vm5, %v2038_v61, %v3487_v36  ;;  %v2634_v61 = vld [vmem:[%s4872_s8] sm:$0x1] }
 0x6a4   : > { %3189 = vmatprep.subr.bf16.mxu0 %v3696_v34  ;;  %v4634_v49 = vpop.permute.xlu0 %2052  ;;  %v2164_v12 = vpack.c.bf16 %v2060_v9, %v2060_v9 }
 0x6a5   : > { %v2061_v51 = vsel %vm572_vm6, %v2047_v47, %v4634_v49  ;;  %v2055_v28 = vpop.permute.xlu1 %2054 }
 0x6a6   : > { %v2165_v52 = vpack.c.bf16 %v2061_v51, %v2061_v51  ;;  %v2056_v27 = vsel %vm572_vm6, %v4634_v49, %v2055_v28 }
 0x6a7   : > { %3190 = vmatpush3.bf16.msra.mxu0 %v3697_v48  ;;  %v2166_v30 = vpack.c.bf16 %v2056_v27, %v2056_v27  ;;  %v2804_v27 = vld [vmem:[%s4877_s13] sm:$0x1] }
 0x6a8   : > { %3191 = vmatprep.subr.bf16.mxu0 %v3698_v50  ;;  %2544 = vmatprep.mubr.bf16.mxu0 %v2165_v52 }
 0x6ab   : > { %3192 = vmatpush3.bf16.msra.mxu0 %v3699_v53 }
 0x6ac   : > { %3193 = vmatprep.subr.bf16.mxu0 %v3700_v54  ;;  %v2632_v54 = vld [vmem:[%s4873_s9] sm:$0x1] }
 0x6af   : > { %3194 = vmatpush3.bf16.msra.mxu0 %v3701_v55  ;;  %v3728_v55 = vld [vmem:[%s4874_s10] sm:$0xff]  }
 0x6b0   : > { %3195 = vmatprep.subr.bf16.mxu0 %v3702_v56  ;;  %v3729_v56 = vld [vmem:[%s4874_s10 + $0x8] sm:$0xff]  }
 0x6b3   : > { %3196 = vmatpush3.bf16.msra.mxu0 %v3703_v57  ;;  %v3730_v57 = vld [vmem:[%s4874_s10 + $0x10] sm:$0xff]  }
 0x6b4   : > { %3197 = vmatprep.subr.bf16.mxu0 %v3704_v58  ;;  %v3731_v58 = vld [vmem:[%s4874_s10 + $0x18] sm:$0xff]  }
 0x6b7   : > { %3198 = vmatpush3.bf16.msra.mxu0 %v3705_v59  ;;  %v3732_v59 = vld [vmem:[%s4874_s10 + $0x20] sm:$0xff]  }
 0x6b8   : > { %3199 = vmatprep.subr.bf16.mxu0 %v3706_v60  ;;  %v3733_v60 = vld [vmem:[%s4874_s10 + $0x28] sm:$0xff]  }
 0x6bb   : > { %3200 = vmatpush3.bf16.msra.mxu0 %v3707_v1  ;;  %v3735_v1 = vld [vmem:[%s4874_s10 + $0x38] ss:$0 sps:$4 sm:$0xff]  }
 0x6bc   : > { %3201 = vmatprep.subr.bf16.mxu0 %v3708_v2  ;;  %v2749_v2 = vsel %vm509_vm3, %v3735_v1, 0 }
 0x6bf   : > { %3202 = vmatpush3.bf16.msra.mxu0 %v3709_v4 }
 0x6c0   : > { %3209 = vmatprep.subr.bf16.mxu0 %v3710_v5 }
 0x6c2   : > { %2545 = vmatmul.mubr.bf16.vlgmr.msra.gmra.mrb[16].mxu0 %v2164_v12 }
 0x6c3   : > { %3210 = vmatpush3.bf16.msra.mxu0 %v3711_v11  ;;  %2584 = vmatprep.mubr.bf16.mxu0 %v2167_v18 }
 0x6c4   : > { %3211 = vmatprep.subr.bf16.mxu0 %v3712_v16  ;;  %v3736_v16 = vld [vmem:[%s4876_s12] sm:$0xff]  }
 0x6c7   : > { %3212 = vmatpush3.bf16.msra.mxu0 %v3713_v19  ;;  %v3737_v19 = vld [vmem:[%s4876_s12 + $0x8] sm:$0xff]  }
 0x6c8   : > { %3213 = vmatprep.subr.bf16.mxu0 %v3714_v20  ;;  %v3738_v20 = vld [vmem:[%s4876_s12 + $0x10] sm:$0xff]  }
 0x6cb   : > { %3214 = vmatpush3.bf16.msra.mxu0 %v3715_v21  ;;  %v3739_v21 = vld [vmem:[%s4876_s12 + $0x18] sm:$0xff]  }
 0x6cc   : > { %3215 = vmatprep.subr.bf16.mxu0 %v3716_v22  ;;  %v3740_v22 = vld [vmem:[%s4876_s12 + $0x20] sm:$0xff]  }
 0x6cf   : > { %3216 = vmatpush3.bf16.msra.mxu0 %v3717_v23  ;;  %v3741_v23 = vld [vmem:[%s4876_s12 + $0x28] ss:$0 sps:$4 sm:$0x33]  }
 0x6d0   : > { %3217 = vmatprep.subr.bf16.mxu0 %v3718_v7  ;;  %v2844_v7 = vsel %vm2842_vm1, %v3741_v23, 0 }
 0x6d3   : > { %3218 = vmatpush3.bf16.msra.mxu0 %v3719_v24  ;;  %v2699_v24 = vld [vmem:[%s4875_s11] sm:$0x1] }
 0x6d4   : > { %3219 = vmatprep.subr.bf16.mxu0 %v3720_v25 }
 0x6d7   : > { %3220 = vmatpush3.bf16.msra.mxu0 %v3721_v6 }
 0x6d8   : > { %3221 = vmatprep.subr.bf16.mxu0 %v3722_v26 }
 0x6db   : > { %3222 = vmatpush3.bf16.msra.mxu0 %v3723_v63 }
 0x6dc   : > { %3223 = vmatprep.subr.bf16.mxu0 %v3724_v0 }
 0x6df   : > { %3224 = vmatpush3.bf16.msra.mxu0 %v3725_v3 }
 0x6e0   : > { %3252 = vmatprep.subr.bf16.mxu0 %v3816_v8 }
 0x6e2   : > { %2585 = vmatmul.mubr.bf16.vlgmr.msra.gmra.mrb[20].mxu0 %v2166_v30 }
 0x6e3   : > { %3253 = vmatpush3.bf16.msra.mxu0 %v3726_v29  ;;  %3256 = vmatprep.mubr.msk.bf16.mxu0 %vm3817_vm15, %v3816_v8 }
 0x6e4   : > { %3254 = vmatprep.subr.bf16.mxu0 %v3816_v8 }
 0x6e7   : > { %3255 = vmatpush3.bf16.msra.mxu0 %v3727_v13 }
 0x6e8   : > { %3260 = vmatprep.subr.bf16.mxu0 %v3816_v8 }
 0x6ea   : > { %3257 = vmatmul.mubr.msk.bf16.vlgmr.msra.gmra.mrb[24].mxu0 %vm562_vm4, %v2168_v35 }
 0x6eb   : > { %3262 = vmatprep.mubr.msk.bf16.mxu0 %vm3817_vm15, %v3816_v8 }
 0x775   : > { %v3181_v37 = vpop.f32.mrb[12].mxu0 }
 0x776   : > { %v3182_v38 = vpop.f32.mrb[13].mxu0 }
 0x777   : > { %v3183_v39 = vadd.f32 %v3182_v38, %v3181_v37  ;;  %v3184_v40 = vpop.f32.mrb[14].mxu0 }
 0x778   : > { %v3185_v41 = vpop.f32.mrb[15].mxu0 }
 0x795   : > { %v3203_v14 = vpop.f32.mrb[16].mxu0 }
 0x796   : > { %v3204_v15 = vpop.f32.mrb[17].mxu0 }
 0x797   : > { %v3205_v17 = vadd.f32 %v3204_v15, %v3203_v14  ;;  %v3206_v31 = vpop.f32.mrb[18].mxu0 }
 0x798   : > { %v3207_v42 = vpop.f32.mrb[19].mxu0 }
 0x799   : > { %v2547_v43 = vadd.f32 %v3205_v17, %v3183_v39 }
 0x7b5   : > { %v3225_v44 = vpop.f32.mrb[20].mxu0 }
 0x7b6   : > { %v3226_v45 = vpop.f32.mrb[21].mxu0 }
 0x7b7   : > { %v3227_v46 = vadd.f32 %v3226_v45, %v3225_v44  ;;  %v3228_v34 = vpop.f32.mrb[22].mxu0 }
 0x7b8   : > { %v3229_v33 = vpop.f32.mrb[23].mxu0 }
 0x7b9   : > { %v2587_v36 = vadd.f32 %v3227_v46, %v2547_v43 }
 0x7bd   : > { %v2626_v47 = vpop.f32.mrb[24].mxu0 }
 0x7be   : > { %v2627_v48 = vadd.f32 %v2626_v47, %v2587_v36  ;;  %v3258_v49 = vpop.f32.mrb[25].mxu0 }
 0x7bf   : > { %v2629_v50 = vpop.f32.mrb[26].mxu0 }
 0x7c0   : > { %v2633_v51 = vpack.c.bf16 %v2627_v48, %v2627_v48  ;;  %v3259_v52 = vpop.f32.mrb[27].mxu0 }
 0x7c2   : > { %v2640_v53 = vsel %vm509_vm3, %v2633_v51, 0 }
 0x7c3   : > { %3261 = vmatpush3.bf16.msra.mxu0 %v2640_v53 }
 0x7c4   : > { %3266 = vmatprep.subr.bf16.mxu0 %v3816_v8 }
 0x7c6   : > { %3263 = vmatmul.mubr.msk.bf16.vlgmr.msra.gmra.mrb[28].mxu0 %vm2635_vm0, %v2632_v54 }
 0x7c7   : > { %3267 = vmatpush3.bf16.msra.mxu0 %v3728_v55  ;;  %3282 = vmatprep.mubr.msk.bf16.mxu0 %vm3817_vm15, %v3816_v8 }
 0x7c8   : > { %3268 = vmatprep.subr.bf16.mxu0 %v3816_v8 }
 0x7cb   : > { %3269 = vmatpush3.bf16.msra.mxu0 %v3729_v56 }
 0x7cc   : > { %3270 = vmatprep.subr.bf16.mxu0 %v3816_v8 }
 0x7cf   : > { %3271 = vmatpush3.bf16.msra.mxu0 %v3730_v57 }
 0x7d0   : > { %3272 = vmatprep.subr.bf16.mxu0 %v3816_v8 }
 0x7d3   : > { %3273 = vmatpush3.bf16.msra.mxu0 %v3731_v58 }
 0x7d4   : > { %3274 = vmatprep.subr.bf16.mxu0 %v3816_v8 }
 0x7d7   : > { %3275 = vmatpush3.bf16.msra.mxu0 %v3732_v59 }
 0x7d8   : > { %3276 = vmatprep.subr.bf16.mxu0 %v3816_v8 }
 0x7db   : > { %3277 = vmatpush3.bf16.msra.mxu0 %v3733_v60 }
 0x7dc   : > { %3278 = vmatprep.subr.bf16.mxu0 %v3816_v8 }
 0x7df   : > { %3279 = vmatpush3.bf16.msra.mxu0 %v3734_v62 }
 0x7e0   : > { %3280 = vmatprep.subr.bf16.mxu0 %v3816_v8 }
 0x7e3   : > { %3281 = vmatpush3.bf16.msra.mxu0 %v2749_v2 }
 0x7e4   : > { %3286 = vmatprep.subr.bf16.mxu0 %v3816_v8 }
 0x899   : > { %v2676_v4 = vpop.f32.mrb[28].mxu0 }
 0x89a   : > { %v2677_v5 = vadd.f32 %v2676_v4, %v2634_v61  ;;  %v3264_v9 = vpop.f32.mrb[29].mxu0 }
 0x89b   : > { %v2679_v10 = vpop.f32.mrb[30].mxu0 }
 0x89c   : > { %v2682_v11 = vmax.f32 %v2677_v5, 0.0  ;;  %v3265_v12 = vpop.f32.mrb[31].mxu0 }
 0x89e   : > { %v2698_v18 = vpack.c.bf16 %v2682_v11, %v2682_v11 }
 0x8a0   : > { %3283 = vmatmul.mubr.msk.bf16.vlgmr.msra.gmra.mrb[32].mxu0 %vm1037_vm11, %v2698_v18 }
 0x8a1   : > { %3287 = vmatpush3.bf16.msra.mxu0 %v3736_v16  ;;  %3298 = vmatprep.mubr.msk.bf16.mxu0 %vm3817_vm15, %v3816_v8 }
 0x8a2   : > { %3288 = vmatprep.subr.bf16.mxu0 %v3816_v8 }
 0x8a5   : > { %3289 = vmatpush3.bf16.msra.mxu0 %v3737_v19 }
 0x8a6   : > { %3290 = vmatprep.subr.bf16.mxu0 %v3816_v8 }
 0x8a9   : > { %3291 = vmatpush3.bf16.msra.mxu0 %v3738_v20 }
 0x8aa   : > { %3292 = vmatprep.subr.bf16.mxu0 %v3816_v8 }
 0x8ad   : > { %3293 = vmatpush3.bf16.msra.mxu0 %v3739_v21 }
 0x8ae   : > { %3294 = vmatprep.subr.bf16.mxu0 %v3816_v8 }
 0x8b1   : > { %3295 = vmatpush3.bf16.msra.mxu0 %v3740_v22 }
 0x8b2   : > { %3296 = vmatprep.subr.bf16.mxu0 %v3816_v8 }
 0x8b5   : > { %3297 = vmatpush3.bf16.msra.mxu0 %v2844_v7 }
 0x973   : > { %v2785_v25 = vpop.f32.mrb[32].mxu0 }
 0x974   : > { %v2786_v6 = vadd.f32 %v2785_v25, %v2699_v24  ;;  %v3284_v26 = vpop.f32.mrb[33].mxu0 }
 0x975   : > { %v2788_v63 = vpop.f32.mrb[34].mxu0 }
 0x976   : > { %v2791_v0 = vmax.f32 %v2786_v6, 0.0  ;;  %v3285_v28 = vpop.f32.mrb[35].mxu0 }
 0x978   : > { %v2803_v3 = vpack.c.bf16 %v2791_v0, %v2791_v0 }
 0x97a   : > { %3299 = vmatmul.mubr.msk.bf16.vlgmr.msra.gmra.mrb[36].mxu0 %vm2838_vm2, %v2803_v3 }
 0xa4d   : > { %v2880_v29 = vpop.f32.mrb[36].mxu0 }
 0xa4e   : > { %v2881_v30 = vadd.f32 %v2880_v29, %v2804_v27  ;;  %v3300_v8 = vpop.f32.mrb[37].mxu0 }
 0xa4f   : > { %v2883_v13 = vpop.f32.mrb[38].mxu0 }
 0xa50   : > { %2886 = vst [vmem:[%s460_s19] sm:$0x1] %v2881_v30  ;;  %v3301_v32 = vpop.f32.mrb[39].mxu0 }
 0xa51   : > { %3755 = shalt.err (!%p3752_p3)
}
 0xa52   : > { %s3756_s18 = scalar_lea.hbm %s4822_s21, 16  ;;  %s3760_s19 = scalar_lea.hbm %s4878_s14, 32 }
 0xa53   : > { %p3757_p4 = scmp.ne.s32.totalorder %s4822_s21, %s3756_s18  ;;  %p3761_p9 = scmp.lt.u32.totalorder %s4822_s21, %s4878_s14 }
 0xa54   : > { %p3762_p10 = scmp.lt.u32.totalorder %s3760_s19, %s3756_s18  ;;  %p3764_p12 = scmp.lt.u32.totalorder %s3756_s18, %s4822_s21 }
 0xa55   : > { %p3758_p7 = pnand %p3757_p4, %p3932_p5 }
 0xa56   : > { %p3763_p11 = por %p3762_p10, %p3761_p9 }
 0xa57   : > { %p3759_p8 = pneg %p3758_p7 }
 0xa58   : > { %p3765_p13 = por %p3764_p12, %p3763_p11 }
 0xa5a   : > { %p3766_p0 = pnand %p3765_p13, %p3759_p8 }
 0xa5c   : > { %3769 = shalt.err (!%p3766_p0)
}
 0xa5d   : > { %3318 = dma.vmem_to_hbm [thread:$0]  (%p3932_p5), %s4824_s22, 16, %s4822_s21, %s2888_s27  }
 0xa5e PF: > { %s4896_s17 = sld [smem:[#allocation5_spill]]  ;;  %p3324_p1 = scmp.ge.s32.totalorder %s3804_s16, 2 }
 0xa60   : > { %p3321_p2 = pnand %p3324_p1, %p3936_p6 }
 0xa64   : > { %s2912_s28 = sand.u32 1, %s4896_s17  }
 0xa65   : > { %s2913_s26 = scalar_lea.sflag [#allocation3], %s2912_s28 }
 0xa66   : > { %3787 = dma.done.wait (!%p3321_p2), %s2913_s26, 16  }
 0xa67   : > { %3789 = vsyncadd (!%p3321_p2), %s2913_s26, 4294967280  ;;  %s4898_s16 = sld [smem:[#allocation7_spill]]  ;;  %s4899_s18 = sld [smem:[#allocation6_spill]] }
 0xa68   : > { %s4900_s15 = sld [smem:[#allocation8_spill]]  ;;  %s4901_s29 = smov %s3796_s30 }
 0xa6d   : > { %p24_p3 = scmp.ge.s32.totalorder %s4898_s16, 4   ;;  %s4902_s30 = smov %s4899_s18 }
 0xa6f   :  { %26 = sbr.rel (!%p24_p3) target bundleno = 3 (0x3), region = 111 }
 0xa76   :  { %2917 = vsyncpa [#allocation3], 1 }
 0xa77   :  { %2919 = vsyncpa [#allocation3 + $0x1], 1 }

</bundles_post_ra>
